<compile_context>
chip_gen: v7x
topology: tpu7x:2x2x1
jax: 0.10.0
libtpu: 0.0.40
codegen_flags: <defaults>
</compile_context>

<pallas_src>
import jax
import jax.numpy as jnp
from jax.experimental import pallas as pl
from jax.experimental.pallas import tpu as pltpu

LANE = 128
TM = 256                        # node-row tile (sweepable; 256-512 good on v5e/v6e/v7x)
VMEM_LIMIT = 48 * 1024 * 1024   # scoped-VMEM request: > v5e 16 MiB default, < v7x 64 MiB phys


def _round_up(x, m):
    return (x + m - 1) // m * m


# ----------------------------- Pallas kernels -------------------------------

def _layer1_kernel(x_ref, w1_ref, a_ref, b1_ref, w2_ref, alpha_ref, out_ref, z1_ref):
    """Per row tile: Z2_tile = PReLU(A_tile @ (X @ W1) + b1) @ W2.

    X (whole view), W1 and W2 are VMEM-resident; Z1 = X @ W1 is computed once
    per view (i == 0) into the persistent scratch and reused by every row
    tile, so neither X nor Z1 is re-streamed from HBM."""
    @pl.when(pl.program_id(1) == 0)
    def _():
        z1_ref[...] = jnp.dot(
            x_ref[...], w1_ref[...], preferred_element_type=jnp.float32
        ).astype(z1_ref.dtype)

    alpha = alpha_ref[0]
    h = jnp.dot(a_ref[...], z1_ref[...],
                preferred_element_type=jnp.float32) + b1_ref[...]
    h = jnp.where(h >= 0.0, h, alpha * h)              # PReLU; Dropout = identity (eval)
    out_ref[...] = jnp.dot(h.astype(w2_ref.dtype), w2_ref[...],
                           preferred_element_type=jnp.float32).astype(out_ref.dtype)


def _layer2_bn_kernel(z2_ref, a_ref, b2_ref, alpha_ref, scale_ref, shift_ref, out_ref):
    """Per row tile: BN_eval(PReLU(A_tile @ Z2 + b2)) into this view's half of
    the [n_p, 2*h_p] lane-dense output slab.  Z2 is VMEM-resident per view and
    the whole reduction over A columns is one MXU call (no k grid axis, no
    accumulator init/finalize)."""
    alpha = alpha_ref[0]
    h = jnp.dot(a_ref[...], z2_ref[...],
                preferred_element_type=jnp.float32) + b2_ref[...]
    h = jnp.where(h >= 0.0, h, alpha * h)              # PReLU
    out_ref[...] = h * scale_ref[...] + shift_ref[...] # folded BatchNorm1d (eval)


# ----------------------------- pallas_call wrappers --------------------------

def _layer1(x_both, a_both, w1, b1, w2, alpha):
    """Z2 = PReLU(A @ (X @ W1) + b1) @ W2, both views.  Returns [2, n_p, h_p] bf16."""
    v_n, n_p, f_p = x_both.shape
    h_p = w1.shape[1]
    return pl.pallas_call(
        _layer1_kernel,
        out_shape=jax.ShapeDtypeStruct((v_n, n_p, h_p), jnp.bfloat16),
        grid_spec=pltpu.PrefetchScalarGridSpec(
            num_scalar_prefetch=0,
            grid=(v_n, n_p // TM),
            in_specs=[
                pl.BlockSpec((None, n_p, f_p), lambda v, i: (v, 0, 0)),  # X: resident / view
                pl.BlockSpec((f_p, h_p), lambda v, i: (0, 0)),           # W1: resident
                pl.BlockSpec((None, TM, n_p), lambda v, i: (v, i, 0)),   # A: streamed stripes
                pl.BlockSpec((1, h_p), lambda v, i: (0, 0)),             # b1
                pl.BlockSpec((h_p, h_p), lambda v, i: (0, 0)),           # W2: resident
                pl.BlockSpec(memory_space=pltpu.MemorySpace.SMEM),       # PReLU alpha scalar
            ],
            out_specs=pl.BlockSpec((None, TM, h_p), lambda v, i: (v, i, 0)),
            scratch_shapes=[pltpu.VMEM((n_p, h_p), jnp.bfloat16)],       # Z1 = X @ W1
        ),
        compiler_params=pltpu.CompilerParams(
            # i carries the per-view Z1-scratch dependency -> must stay "arbitrary";
            # v=2 gives the natural one-view-per-TensorCore split on v7x megacore.
            dimension_semantics=("parallel", "arbitrary"),
            vmem_limit_bytes=VMEM_LIMIT),
    )(x_both, w1, a_both, b1, w2, alpha)


def _layer2_bn(z2_both, a_both, b2, alpha, bn_scale, bn_shift):
    """BN(PReLU(A @ Z2 + b2)), both views written into one [n_p, 2*h_p] slab."""
    v_n, n_p, h_p = z2_both.shape
    return pl.pallas_call(
        _layer2_bn_kernel,
        out_shape=jax.ShapeDtypeStruct((n_p, v_n * h_p), jnp.float32),
        grid_spec=pltpu.PrefetchScalarGridSpec(
            num_scalar_prefetch=0,
            grid=(v_n, n_p // TM),
            in_specs=[
                pl.BlockSpec((None, n_p, h_p), lambda v, i: (v, 0, 0)),  # Z2: resident / view
                pl.BlockSpec((None, TM, n_p), lambda v, i: (v, i, 0)),   # A: streamed stripes
                pl.BlockSpec((1, h_p), lambda v, i: (0, 0)),             # b2
                pl.BlockSpec(memory_space=pltpu.MemorySpace.SMEM),       # PReLU alpha scalar
                pl.BlockSpec((1, h_p), lambda v, i: (0, 0)),             # folded BN scale
                pl.BlockSpec((1, h_p), lambda v, i: (0, 0)),             # folded BN shift
            ],
            out_specs=pl.BlockSpec((TM, h_p), lambda v, i: (i, v)),
        ),
        compiler_params=pltpu.CompilerParams(
            dimension_semantics=("parallel", "parallel"),
            vmem_limit_bytes=VMEM_LIMIT),
    )(z2_both, a_both, b2, alpha, bn_scale, bn_shift)


def _estimate_vmem_bytes(n_p, f_p, h_p):
    """Rough double-buffered VMEM budget of the heavier of the two kernels."""
    bf2 = 2
    k1 = (2 * n_p * f_p * bf2      # X resident (double-buffered by BlockSpec)
          + 2 * f_p * h_p * bf2    # W1
          + 2 * TM * n_p * bf2     # A row stripe
          + 2 * h_p * h_p * bf2    # W2
          + 2 * TM * h_p * bf2     # bf16 output tile
          + n_p * h_p * bf2)       # Z1 scratch
    k2 = (2 * n_p * h_p * bf2      # Z2 resident
          + 2 * TM * n_p * bf2     # A row stripe
          + 2 * TM * h_p * 4)      # f32 output tile
    return max(k1, k2)


# ----------------------------- JAX glue -------------------------------------

def build_norm_adj_padded(edge_index, edge_weight, keep_mask, n, n_p):
    """Padded, bf16 D^{-1/2}(A+I)D^{-1/2} built in one pass (scatter into the
    pre-padded buffer; padded rows/cols stay exactly zero)."""
    w = edge_weight * keep_mask
    adj = jnp.zeros((n_p, n_p), jnp.float32).at[edge_index[0], edge_index[1]].add(w)
    idx = jnp.arange(n)
    adj = adj.at[idx, idx].add(1.0)                      # self loops on real nodes only
    deg = adj.sum(axis=1)
    d_inv_sqrt = jnp.where(deg > 0.0, jax.lax.rsqrt(jnp.maximum(deg, 1e-12)), 0.0)
    return (adj * d_inv_sqrt[:, None] * d_inv_sqrt[None, :]).astype(jnp.bfloat16)


def augment(key, x_padded, edge_index, edge_weight, drop_rate, n, n_p, nfeat, f_p):
    """EdgeRemoving(pe) + FeatureMasking(pf) with a deterministic key."""
    k_edge, k_feat = jax.random.split(key)
    keep_edges = jax.random.bernoulli(
        k_edge, 1.0 - drop_rate, (edge_index.shape[1],)).astype(jnp.float32)
    feat_mask = jax.random.bernoulli(k_feat, 1.0 - drop_rate, (nfeat,))
    mask_p = jnp.zeros((f_p,), jnp.bfloat16).at[:nfeat].set(feat_mask.astype(jnp.bfloat16))
    x_aug = x_padded * mask_p[None, :]
    a_hat = build_norm_adj_padded(edge_index, edge_weight, keep_edges, n, n_p)
    return x_aug, a_hat


def init_params(key, nfeat, nhid):
    k1, k2 = jax.random.split(key)

    def glorot(k, fan_in, fan_out):
        limit = jnp.sqrt(6.0 / (fan_in + fan_out))
        return jax.random.uniform(k, (fan_in, fan_out), jnp.float32, -limit, limit)

    return {
        "w1": glorot(k1, nfeat, nhid),
        "b1": jnp.zeros((1, nhid), jnp.float32),
        "w2": glorot(k2, nhid, nhid),
        "b2": jnp.zeros((1, nhid), jnp.float32),
        "prelu_alpha": jnp.full((1,), 0.25, jnp.float32),
        "bn_gamma": jnp.ones((1, nhid), jnp.float32),
        "bn_beta": jnp.zeros((1, nhid), jnp.float32),
        "bn_mean": jnp.zeros((1, nhid), jnp.float32),
        "bn_var": jnp.ones((1, nhid), jnp.float32),
    }


def prepare_padded_params(params, nfeat, nhid):
    """Zero-pad to lane-dense (x128) dims, cast matmul weights to bf16, fold BN."""
    f_p = _round_up(nfeat, LANE)
    h_p = _round_up(nhid, LANE)
    w1 = jnp.zeros((f_p, h_p), jnp.float32).at[:nfeat, :nhid].set(
        params["w1"]).astype(jnp.bfloat16)
    w2 = jnp.zeros((h_p, h_p), jnp.float32).at[:nhid, :nhid].set(
        params["w2"]).astype(jnp.bfloat16)
    b1 = jnp.zeros((1, h_p), jnp.float32).at[:, :nhid].set(params["b1"])
    b2 = jnp.zeros((1, h_p), jnp.float32).at[:, :nhid].set(params["b2"])
    # Fold BatchNorm1d (eval) into scale/shift once, in the wrapper.
    scale = params["bn_gamma"] * jax.lax.rsqrt(params["bn_var"] + 1e-5)
    shift = params["bn_beta"] - params["bn_mean"] * scale
    bn_scale = jnp.ones((1, h_p), jnp.float32).at[:, :nhid].set(scale)
    bn_shift = jnp.zeros((1, h_p), jnp.float32).at[:, :nhid].set(shift)
    return {
        "w1": w1, "w2": w2, "b1": b1, "b2": b2,
        "bn_scale": bn_scale, "bn_shift": bn_shift,
        "alpha": params["prelu_alpha"].reshape(-1)[:1].astype(jnp.float32),
        "f_p": f_p, "h_p": h_p,
    }


def bgrl_forward(x, edge_index, edge_weight, params,
                 drop_edge_rate_1=0.2, drop_edge_rate_2=0.2, aug_key=None):
    """BGRL.forward: two augmented views -> shared GCN encoder -> concat."""
    n, nfeat = x.shape
    nhid = params["w1"].shape[1]
    if aug_key is None:
        aug_key = jax.random.PRNGKey(0)
    key1, key2 = jax.random.split(aug_key)

    pp = prepare_padded_params(params, nfeat, nhid)
    f_p, h_p = pp["f_p"], pp["h_p"]
    n_p = _round_up(max(n, TM), TM)

    est = _estimate_vmem_bytes(n_p, f_p, h_p)
    if est > VMEM_LIMIT:
        # TODO(synk): reintroduce a k-reduction grid axis / CSR blocks for graphs
        # whose [TM, n_p] A stripe + resident Z no longer fit the VMEM budget.
        raise ValueError(f"estimated VMEM {est} B exceeds budget {VMEM_LIMIT} B; "
                         f"reduce TM or add a k axis")

    # Padded bf16 features built once; per-view feature masks applied on top.
    x_padded = jnp.zeros((n_p, f_p), jnp.bfloat16).at[:n, :nfeat].set(
        x.astype(jnp.bfloat16))

    # Per the reference module, the same rate is used for edge & feature drop.
    x1, a1 = augment(key1, x_padded, edge_index, edge_weight,
                     drop_edge_rate_1, n, n_p, nfeat, f_p)
    x2, a2 = augment(key2, x_padded, edge_index, edge_weight,
                     drop_edge_rate_2, n, n_p, nfeat, f_p)

    # Stack both views on a leading axis so one kernel launch handles both.
    x_both = jnp.stack([x1, x2])      # [2, n_p, f_p] bf16
    a_both = jnp.stack([a1, a2])      # [2, n_p, n_p] bf16

    z2 = _layer1(x_both, a_both, pp["w1"], pp["b1"], pp["w2"], pp["alpha"])
    out = _layer2_bn(z2, a_both, pp["b2"], pp["alpha"],
                     pp["bn_scale"], pp["bn_shift"])          # [n_p, 2*h_p] f32

    # Strip padding: view 0 lives in cols [0, nhid), view 1 in [h_p, h_p+nhid).
    return jnp.concatenate([out[:n, :nhid], out[:n, h_p:h_p + nhid]], axis=1)


# ----------------------------- main -----------------------------------------

if __name__ == "__main__":
    N_NODES, NFEAT, NHID = 16, 32, 32

    root = jax.random.PRNGKey(0)
    k_x, k_edges, k_params, k_aug = jax.random.split(root, 4)

    # Deterministic node features.
    x = jax.random.normal(k_x, (N_NODES, NFEAT), jnp.float32)

    # Deterministic small graph: ring edges + a few random chords, both directions.
    ring_src = jnp.arange(N_NODES)
    ring_dst = (ring_src + 1) % N_NODES
    rand_src = jax.random.randint(k_edges, (8,), 0, N_NODES)
    rand_dst = jax.random.randint(jax.random.fold_in(k_edges, 1), (8,), 0, N_NODES)
    src = jnp.concatenate([ring_src, ring_dst, rand_src, rand_dst])
    dst = jnp.concatenate([ring_dst, ring_src, rand_dst, rand_src])
    edge_index = jnp.stack([src, dst], axis=0)                     # [2, E]
    edge_weight = jnp.ones((edge_index.shape[1],), jnp.float32)    # [E]

    params = init_params(k_params, NFEAT, NHID)

    z = bgrl_forward(x, edge_index, edge_weight, params,
                     drop_edge_rate_1=0.2, drop_edge_rate_2=0.2, aug_key=k_aug)
    z = jax.block_until_ready(z)

    assert z.shape == (N_NODES, 2 * NHID), z.shape
    assert jnp.all(jnp.isfinite(z))
    print("KERNEL_OK")
</pallas_src>

<mosaic_0001>
module attributes {stable_mosaic.version = 11 : i64} {
  func.func @_layer1_kernel(%arg0: i32, %arg1: i32, %arg2: memref<1x256x128xbf16, #tpu.memory_space<vmem>>, %arg3: memref<128x128xbf16, #tpu.memory_space<vmem>>, %arg4: memref<1x256x256xbf16, #tpu.memory_space<vmem>>, %arg5: memref<1x128xf32, #tpu.memory_space<vmem>>, %arg6: memref<128x128xbf16, #tpu.memory_space<vmem>>, %arg7: memref<1xf32, #tpu.memory_space<smem>>, %arg8: memref<1x256x128xbf16, #tpu.memory_space<vmem>>, %arg9: memref<256x128xbf16, #tpu.memory_space<vmem>>) attributes {dimension_semantics = [#tpu.dimension_semantics<parallel>, #tpu.dimension_semantics<arbitrary>], iteration_bounds = array<i64: 2, 1>, scalar_prefetch = 0 : i64, scratch_operands = 1 : i64, tpu.core_type = #tpu.core_type<tc>, window_params = [{transform_indices = @transform_0, window_bounds = array<i64: 1, 256, 128>}, {pipeline_mode = #tpu.pipeline_mode<synchronous>, transform_indices = @transform_1, window_bounds = array<i64: 128, 128>}, {transform_indices = @transform_2, window_bounds = array<i64: 1, 256, 256>}, {pipeline_mode = #tpu.pipeline_mode<synchronous>, transform_indices = @transform_3, window_bounds = array<i64: 1, 128>}, {pipeline_mode = #tpu.pipeline_mode<synchronous>, transform_indices = @transform_4, window_bounds = array<i64: 128, 128>}, {transform_indices = @transform_5, window_bounds = array<i64: 1>}, {transform_indices = @transform_6, window_bounds = array<i64: 1, 256, 128>}]} {
    %c0_i32 = arith.constant 0 : i32
    %0 = arith.cmpi eq, %arg1, %c0_i32 : i32
    %1 = arith.extui %0 : i1 to i32
    %c0_i32_0 = arith.constant 0 : i32
    %2 = arith.cmpi ne, %1, %c0_i32_0 : i32
    scf.if %2 {
      %c0_15 = arith.constant 0 : index
      %c0_16 = arith.constant 0 : index
      %c0_17 = arith.constant 0 : index
      %23 = vector.load %arg2[%c0_15, %c0_16, %c0_17] : memref<1x256x128xbf16, #tpu.memory_space<vmem>>, vector<1x256x128xbf16>
      %24 = vector.shape_cast %23 : vector<1x256x128xbf16> to vector<256x128xbf16>
      %c0_18 = arith.constant 0 : index
      %c0_19 = arith.constant 0 : index
      %25 = vector.load %arg3[%c0_18, %c0_19] : memref<128x128xbf16, #tpu.memory_space<vmem>>, vector<128x128xbf16>
      %cst_20 = arith.constant dense<0.000000e+00> : vector<256x128xf32>
      %26 = tpu.matmul %24, %25, %cst_20 {dimension_numbers = #tpu.dot_dimension_numbers<[1], [0], [0], [1], [0, 0, 1, 1], [], []>} : vector<256x128xbf16>, vector<128x128xbf16>, vector<256x128xf32> -> vector<256x128xf32>
      %27 = arith.truncf %26 : vector<256x128xf32> to vector<256x128xbf16>
      %c0_21 = arith.constant 0 : index
      %c0_22 = arith.constant 0 : index
      %28 = vector.load %arg9[%c0_21, %c0_22] : memref<256x128xbf16, #tpu.memory_space<vmem>>, vector<256x128xbf16>
      tpu.vector_store %arg9[%c0_21, %c0_22], %27 {strides = array<i32>} : memref<256x128xbf16, #tpu.memory_space<vmem>>, vector<256x128xbf16>,
    } else {
    }
    %c0 = arith.constant 0 : index
    %3 = memref.load %arg7[%c0] : memref<1xf32, #tpu.memory_space<smem>>
    %c0_1 = arith.constant 0 : index
    %c0_2 = arith.constant 0 : index
    %c0_3 = arith.constant 0 : index
    %4 = vector.load %arg4[%c0_1, %c0_2, %c0_3] : memref<1x256x256xbf16, #tpu.memory_space<vmem>>, vector<1x256x256xbf16>
    %5 = vector.shape_cast %4 : vector<1x256x256xbf16> to vector<256x256xbf16>
    %c0_4 = arith.constant 0 : index
    %c0_5 = arith.constant 0 : index
    %6 = vector.load %arg9[%c0_4, %c0_5] : memref<256x128xbf16, #tpu.memory_space<vmem>>, vector<256x128xbf16>
    %cst = arith.constant dense<0.000000e+00> : vector<256x128xf32>
    %7 = tpu.matmul %5, %6, %cst {dimension_numbers = #tpu.dot_dimension_numbers<[1], [0], [0], [1], [0, 0, 1, 1], [], []>} : vector<256x256xbf16>, vector<256x128xbf16>, vector<256x128xf32> -> vector<256x128xf32>
    %c0_6 = arith.constant 0 : index
    %c0_7 = arith.constant 0 : index
    %8 = vector.load %arg5[%c0_6, %c0_7] : memref<1x128xf32, #tpu.memory_space<vmem>>, vector<1x128xf32>
    %9 = vector.broadcast %8 : vector<1x128xf32> to vector<256x128xf32>
    %10 = arith.addf %7, %9 : vector<256x128xf32>
    %cst_8 = arith.constant 0.000000e+00 : f32
    %11 = vector.broadcast %cst_8 : f32 to vector<256x128xf32>
    %12 = arith.cmpf oge, %10, %11 : vector<256x128xf32>
    %13 = vector.broadcast %3 : f32 to vector<256x128xf32>
    %14 = arith.mulf %13, %10 : vector<256x128xf32>
    %15 = arith.select %12, %10, %14 : vector<256x128xi1>, vector<256x128xf32>
    %16 = arith.truncf %15 : vector<256x128xf32> to vector<256x128xbf16>
    %c0_9 = arith.constant 0 : index
    %c0_10 = arith.constant 0 : index
    %17 = vector.load %arg6[%c0_9, %c0_10] : memref<128x128xbf16, #tpu.memory_space<vmem>>, vector<128x128xbf16>
    %cst_11 = arith.constant dense<0.000000e+00> : vector<256x128xf32>
    %18 = tpu.matmul %16, %17, %cst_11 {dimension_numbers = #tpu.dot_dimension_numbers<[1], [0], [0], [1], [0, 0, 1, 1], [], []>} : vector<256x128xbf16>, vector<128x128xbf16>, vector<256x128xf32> -> vector<256x128xf32>
    %19 = arith.truncf %18 : vector<256x128xf32> to vector<256x128xbf16>
    %c0_12 = arith.constant 0 : index
    %c0_13 = arith.constant 0 : index
    %c0_14 = arith.constant 0 : index
    %20 = vector.load %arg8[%c0_12, %c0_13, %c0_14] : memref<1x256x128xbf16, #tpu.memory_space<vmem>>, vector<1x256x128xbf16>
    %21 = vector.shape_cast %20 : vector<1x256x128xbf16> to vector<256x128xbf16>
    %22 = vector.shape_cast %19 : vector<256x128xbf16> to vector<1x256x128xbf16>
    tpu.vector_store %arg8[%c0_12, %c0_13, %c0_14], %22 {strides = array<i32>} : memref<1x256x128xbf16, #tpu.memory_space<vmem>>, vector<1x256x128xbf16>,
    return
  }
  func.func @transform_0(%arg0: i32, %arg1: i32) -> (i32, i32, i32) {
    %c0_i32 = arith.constant 0 : i32
    %c0_i32_0 = arith.constant 0 : i32
    %c0_i32_1 = arith.constant 0 : i32
    return %arg0, %c0_i32, %c0_i32_0 : i32, i32, i32
  }
  func.func @transform_1(%arg0: i32, %arg1: i32) -> (i32, i32) {
    %c0_i32 = arith.constant 0 : i32
    %c0_i32_0 = arith.constant 0 : i32
    %c0_i32_1 = arith.constant 0 : i32
    return %c0_i32, %c0_i32_0 : i32, i32
  }
  func.func @transform_2(%arg0: i32, %arg1: i32) -> (i32, i32, i32) {
    %c0_i32 = arith.constant 0 : i32
    %c0_i32_0 = arith.constant 0 : i32
    return %arg0, %arg1, %c0_i32 : i32, i32, i32
  }
  func.func @transform_3(%arg0: i32, %arg1: i32) -> (i32, i32) {
    %c0_i32 = arith.constant 0 : i32
    %c0_i32_0 = arith.constant 0 : i32
    %c0_i32_1 = arith.constant 0 : i32
    return %c0_i32, %c0_i32_0 : i32, i32
  }
  func.func @transform_4(%arg0: i32, %arg1: i32) -> (i32, i32) {
    %c0_i32 = arith.constant 0 : i32
    %c0_i32_0 = arith.constant 0 : i32
    %c0_i32_1 = arith.constant 0 : i32
    return %c0_i32, %c0_i32_0 : i32, i32
  }
  func.func @transform_5(%arg0: i32, %arg1: i32) -> i32 {
    %c0_i32 = arith.constant 0 : i32
    %c0_i32_0 = arith.constant 0 : i32
    return %c0_i32 : i32
  }
  func.func @transform_6(%arg0: i32, %arg1: i32) -> (i32, i32, i32) {
    %c0_i32 = arith.constant 0 : i32
    %c0_i32_0 = arith.constant 0 : i32
    return %arg0, %arg1, %c0_i32 : i32, i32, i32
  }
}

</mosaic_0001>

<bundles_post_ra>
// kernel: tpu_custom_call.1
= control target key start
LH: loop header
LB: loop body
LE: loop exit
PB: predicated region body
PF: predicated region fallthrough
CT: control target
= control target key end

     0   :  { %s3147_s0 = inlined_call_operand.hbm [shape: bf16[2,256,128], index: 0, kind: input, shape index: {}]   ;;  %s3148_s1 = inlined_call_operand.hbm [shape: bf16[128,128], index: 1, kind: input, shape index: {}]   ;;  %s3149_s2 = inlined_call_operand.hbm [shape: bf16[2,256,256], index: 2, kind: input, shape index: {}]   ;;  %s3150_s3 = inlined_call_operand.vmem [shape: f32[1,128], index: 3, kind: input, shape index: {}]   ;;  %s3151_s4 = inlined_call_operand.hbm [shape: bf16[128,128], index: 4, kind: input, shape index: {}]   ;;  %s3152_s5 = inlined_call_operand.<no memory space> [shape: f32[1], index: 5, kind: input, shape index: {}]   ;;  %s3153_s6 = inlined_call_operand.hbm [shape: bf16[2,256,128], index: 6, kind: output, shape index: {}]  }
   0x1   :  { %3173 = sst [smem:[#allocation23_spill]] %s3147_s0 }
   0x2   :  { %3174 = sst [smem:[#allocation24_spill]] %s3148_s1 }
   0x3   :  { %3175 = sst [smem:[#allocation25_spill]] %s3153_s6 }
   0x4   :  { %11 = sst [smem:[#allocation3]] %s3152_s5 }
   0x5   :  { %12 = vsyncpa [#allocation5], 0 }
   0x6   :  { %14 = vsyncpa [#allocation5 + $0x1], 0 }
   0x7   :  { %15 = vsyncpa [#allocation8], 0 }
   0x8   :  { %16 = vsyncpa [#allocation6], 0 }
   0x9   :  { %18 = vsyncpa [#allocation6 + $0x1], 0  ;;  %s2706_s23 = smov 0   ;;  %s2708_s24 = smov 0  }
   0xa   :  { %s2710_s25 = smov 0   ;;  %s2712_s26 = smov 0  }
   0xb   :  { %s2714_s27 = smov 0   ;;  %s2716_s28 = smov 0  }
   0xc LB: > { %3176 = sst [smem:[#allocation17_spill]] %s2635_s23  ;;  %s2737_s5 = sadd.s32 4294967295, %s2655_s28   ;;  %s2655_s28 = sphi %s2716_s28, %s24_s28   ;;  %s2651_s27 = sphi %s2714_s27, %s3218_s27   ;;  %s2647_s26 = sphi %s2712_s26, %s3217_s26   ;;  %s2643_s25 = sphi %s2710_s25, %s3213_s25   ;;  %s2639_s24 = sphi %s2708_s24, %s3216_s24   ;;  %s2635_s23 = sphi %s2706_s23, %s3215_s23  }
   0xd   : > { %3177 = sst [smem:[#allocation18_spill]] %s2643_s25  ;;  %s1766_s29 = sadd.s32 4294967294, %s2655_s28  }
   0xe   : > { %3178 = sst [smem:[#allocation19_spill]] %s2655_s28  ;;  %p56_p0 = scmp.ne.s32.totalorder %s2639_s24, %s2635_s23 }
   0xf   : > { %p3154_p1 = scmp.eq.s32.totalorder %s2737_s5, 0  ;;  %p200_p3 = scmp.eq.s32.totalorder %s1766_s29, 1 }
  0x10   : > { %p1767_p5 = scmp.ge.s32.totalorder %s2655_s28, 1  ;;  %p207_p7 = scmp.lt.s32.totalorder %s2655_s28, 3 }
  0x11   : > { %p2746_p4 = por %p3154_p1, %p56_p0  ;;  %p2751_p6 = por %p200_p3, %p56_p0 }
  0x12   : > { %p2756_p8 = pnand %p1767_p5, %p207_p7  ;;  %s2657_s9 = smov [#allocation7]  }
  0x13   : > { %s3179_s30 = scalar_select %p2746_p4, 1, 0 }
  0x14   : > { %s3180_s7 = scalar_select %p2751_p6, 1, 0 }
  0x15   : > { %s3182_s8 = scalar_select %p2756_p8, 1, 0 }
  0x16   : > { %3181 = sst [smem:[#allocation20_spill]] %s3180_s7  ;;  %s219_s10 = sshll.u32 %s2657_s9, 4  ;;  %s220_s10 = int_to_ptr.vmem [resolvable:$true] %s219_s10 }
  0x17   : > { %p2285_p9 = pneg %p2756_p8  ;;  %s36_s12 = sadd.s32 1, %s2651_s27 }
  0x18   : > { %s3184_s1 = sld [smem:[#allocation24_spill]] }
  0x19   : > { %p2765_p11 = pnand %p2285_p9, %p3154_p1 }
  0x1b   : > { %p3162_p13 = pneg %p2765_p11 }
  0x1e   : > { %s2445_s15 = scalar_lea.hbm %s3184_s1, 1024 }
  0x1f   : > { %p2446_p12 = scmp.ne.s32.totalorder %s3184_s1, %s2445_s15  ;;  %p2452_p5 = scmp.lt.u32.totalorder %s2445_s15, %s3184_s1 }
  0x21   : > { %p2448_p0 = pnand %p3162_p13, %p2446_p12 }
  0x23   : > { %p2449_p3 = pneg %p2448_p0 }
  0x25   : > { %p2454_p7 = pnand %p2452_p5, %p2449_p3 }
  0x27   : > { %2457 = shalt.err (!%p2454_p7)
}
  0x28   : > { %s2458_s20 = scalar_lea.vmem %s220_s10, 1024  ;;  %p2466_p2 = scmp.lt.s32.totalorder %s220_s10, %s220_s10 }
  0x29   : > { %p2459_p9 = scmp.ne.s32.totalorder %s220_s10, %s2458_s20  ;;  %p2467_p6 = scmp.lt.s32.totalorder %s2458_s20, %s2458_s20 }
  0x2b   : > { %p2461_p10 = pnand %p2459_p9, %p3162_p13  ;;  %p2468_p4 = por %p2467_p6, %p2466_p2 }
  0x2d   : > { %p2462_p1 = pneg %p2461_p10 }
  0x2f   : > { %p2469_p8 = pnand %p2468_p4, %p2462_p1 }
  0x31   : > { %2472 = shalt.err (!%p2469_p8)
}
  0x32   : > { %s3157_s21 = smov 64   ;;  %s3159_s22 = smov 4  }
  0x33   : > { %2288 = dma.hbm_to_vmem [thread:$0]  (!%p2765_p11), %s3184_s1, 1024, %s220_s10, [#allocation8], %s3157_s21, %s3157_s21, %s3159_s22  }
  0x34   : > { %p38_p1 = scmp.ge.s32.totalorder %s36_s12, 2  ;;  %s43_s13 = sadd.s32 1, %s2643_s25 }
  0x35   : > { %p50_p2 = scmp.ne.s32.totalorder %s2643_s25, %s2639_s24  ;;  %p51_p4 = scmp.eq.s32.totalorder %s2655_s28, 0 }
  0x36   : > { %s3220_s12 = smov (%p38_p1, %s36_s12), 0  ;;  %p3187_p8 = scmp.eq.s32.totalorder %s2737_s5, 1 }
  0x37   : > { %3185 = sst [smem:[#allocation21_spill]] %s3220_s12  ;;  %p2801_p6 = por %p51_p4, %p50_p2 }
  0x38   : > { %p2807_p10 = por %p3187_p8, %p50_p2  ;;  %s40_s16 = ssub.s32 %s2651_s27, %s3220_s12 }
  0x39   : > { %p2305_p12 = scmp.lt.s32.totalorder %s2655_s28, 2  ;;  %p41_p0 = scmp.eq.s32.totalorder %s40_s16, 0 }
  0x3a   : > { %s3188_s15 = scalar_select %p2807_p10, 1, 0 }
  0x3b   : > { %s252_s10 = sand.u32 1, %s2655_s28   ;;  %s254_s17 = sand.u32 1, %s2643_s25  }
  0x3c   : > { %s2817_s18 = scalar_select %p41_p0, %s2643_s25, %s43_s13  }
  0x3d   : > { %s1771_s19 = sshll.u32 %s254_s17, 7  ;;  %s1885_s20 = sshll.u32 %s2651_s27, 11 }
  0x3e   : > { %3189 = sst [smem:[#allocation22_spill]] %s2817_s18  ;;  %s3190_s0 = sld [smem:[#allocation23_spill]] }
  0x3f   : > { %s256_s22 = scalar_lea.vmem [#allocation4], %s1771_s19  ;;  %p2827_p3 = pnand %p2305_p12, %p2801_p6 }
  0x40   : > { %s263_s1 = sshll.u32 %s256_s22, 4  ;;  %s2833_s13 = sshll.u32 %s254_s17, 8  ;;  %s2831_s1 = int_to_ptr.vmem [resolvable:$true] %s263_s1 }
  0x41   : > { %s3191_s16 = scalar_select %p2827_p3, 1, 0 }
  0x42   : > { %s2835_s29 = scalar_lea.sflag [#allocation5], %s252_s10  ;;  %p3170_p7 = pneg %p2827_p3 }
  0x44   : > { %s2823_s21 = scalar_lea.hbm %s3190_s0, %s1885_s20  ;;  %s2478_s19 = scalar_lea.hbm %s3190_s0, 4096 }
  0x45   : > { %s2473_s20 = scalar_lea.hbm %s2823_s21, 2048  ;;  %p2479_p2 = scmp.lt.u32.totalorder %s2823_s21, %s3190_s0 }
  0x46   : > { %p2474_p5 = scmp.ne.s32.totalorder %s2823_s21, %s2473_s20  ;;  %p2480_p4 = scmp.lt.u32.totalorder %s2478_s19, %s2473_s20 }
  0x47   : > { %p2482_p8 = scmp.lt.u32.totalorder %s2473_s20, %s2823_s21 }
  0x48   : > { %p2476_p9 = pnand %p3170_p7, %p2474_p5  ;;  %p2481_p6 = por %p2480_p4, %p2479_p2 }
  0x4a   : > { %p2477_p1 = pneg %p2476_p9  ;;  %p2483_p12 = por %p2482_p8, %p2481_p6 }
  0x4c   : > { %p2484_p0 = pnand %p2483_p12, %p2477_p1 }
  0x4e   : > { %2487 = shalt.err (!%p2484_p0)
}
  0x4f   : > { %s2488_s10 = scalar_lea.vmem %s2831_s1, 2048  ;;  %s2660_s17 = smov [#allocation4]  }
  0x50   : > { %p2489_p5 = scmp.ne.s32.totalorder %s2831_s1, %s2488_s10  ;;  %s2493_s22 = sshll.u32 %s2660_s17, 4  ;;  %s2494_s22 = int_to_ptr.vmem [resolvable:$false] %s2493_s22 }
  0x51   : > { %s2495_s12 = scalar_lea.vmem %s2494_s22, 4096  ;;  %p2496_p10 = scmp.lt.s32.totalorder %s2831_s1, %s2494_s22 }
  0x52   : > { %p2491_p9 = pnand %p2489_p5, %p3170_p7  ;;  %p2497_p2 = scmp.lt.s32.totalorder %s2495_s12, %s2488_s10 }
  0x54   : > { %p2492_p13 = pneg %p2491_p9  ;;  %p2498_p4 = por %p2497_p2, %p2496_p10 }
  0x56   : > { %p2499_p6 = pnand %p2498_p4, %p2492_p13 }
  0x58   : > { %2502 = shalt.err (!%p2499_p6)
}
  0x59   : > { %s3192_s20 = smov 4   ;;  %s3193_s14 = smov 64  }
  0x5a   : > { %2295 = dma.hbm_to_vmem [thread:$0]  (!%p2827_p3), %s2823_s21, 2048, %s2831_s1, %s2835_s29, %s3193_s14, %s3193_s14, %s3192_s20  }
  0x5b   : > { %s277_s19 = scalar_lea.vmem [#allocation9], %s2833_s13  ;;  %s2661_s17 = smov [#allocation10]  }
  0x5c   : > { %s287_s9 = sshll.u32 %s277_s19, 4  ;;  %s235_s22 = sshll.u32 %s2661_s17, 4  ;;  %s236_s22 = int_to_ptr.vmem [resolvable:$true] %s235_s22  ;;  %s2896_s9 = int_to_ptr.vmem [resolvable:$true] %s287_s9 }
  0x5d   : > { %s1886_s10 = sshll.u32 %s2651_s27, 12  ;;  %s2503_s7 = scalar_lea.hbm %s3151_s4, 1024 }
  0x5e   : > { %s2871_s18 = scalar_lea.hbm %s3149_s2, %s1886_s10  ;;  %p2504_p13 = scmp.ne.s32.totalorder %s3151_s4, %s2503_s7 }
  0x5f   : > { %p3194_p10 = pneg %p2765_p11  ;;  %p2510_p12 = scmp.lt.u32.totalorder %s2503_s7, %s3151_s4 }
  0x61   : > { %p2506_p1 = pnand %p2504_p13, %p3194_p10 }
  0x63   : > { %p2507_p8 = pneg %p2506_p1 }
  0x65   : > { %p2512_p0 = pnand %p2510_p12, %p2507_p8 }
  0x67   : > { %2515 = shalt.err (!%p2512_p0)
}
  0x68   : > { %s2516_s0 = scalar_lea.vmem %s236_s22, 1024  ;;  %p3195_p9 = pmov %p3194_p10 }
  0x69   : > { %p2517_p5 = scmp.ne.s32.totalorder %s236_s22, %s2516_s0  ;;  %p2524_p6 = scmp.lt.s32.totalorder %s236_s22, %s236_s22 }
  0x6a   : > { %p2525_p7 = scmp.lt.s32.totalorder %s2516_s0, %s2516_s0 }
  0x6b   : > { %p2519_p2 = pnand %p2517_p5, %p3195_p9 }
  0x6c   : > { %p2526_p3 = por %p2525_p7, %p2524_p6 }
  0x6d   : > { %p2520_p4 = pneg %p2519_p2 }
  0x6f   : > { %p2527_p10 = pnand %p2526_p3, %p2520_p4 }
  0x71   : > { %2530 = shalt.err (!%p2527_p10)
}
  0x72   : > { %2291 = dma.hbm_to_vmem [thread:$0]  (!%p2765_p11), %s3151_s4, 1024, %s236_s22, [#allocation8], %s3193_s14, %s3193_s14, %s3192_s20  }
  0x73   : > { %s2531_s25 = scalar_lea.hbm %s2871_s18, 4096  ;;  %p3196_p3 = scmp.ne.s32.totalorder %s3191_s16, 0 }
  0x74   : > { %p2532_p7 = scmp.ne.s32.totalorder %s2871_s18, %s2531_s25  ;;  %s2536_s11 = scalar_lea.hbm %s3149_s2, 8192 }
  0x75   : > { %p3197_p13 = pneg %p3196_p3  ;;  %p2537_p12 = scmp.lt.u32.totalorder %s2871_s18, %s3149_s2 }
  0x76   : > { %p2538_p0 = scmp.lt.u32.totalorder %s2536_s11, %s2531_s25  ;;  %p2540_p9 = scmp.lt.u32.totalorder %s2531_s25, %s2871_s18 }
  0x77   : > { %p2534_p1 = pnand %p2532_p7, %p3197_p13 }
  0x78   : > { %p2539_p5 = por %p2538_p0, %p2537_p12 }
  0x79   : > { %p2535_p8 = pneg %p2534_p1 }
  0x7a   : > { %p2541_p11 = por %p2540_p9, %p2539_p5 }
  0x7c   : > { %p2542_p2 = pnand %p2541_p11, %p2535_p8 }
  0x7e   : > { %2545 = shalt.err (!%p2542_p2)
}
  0x7f   : > { %s2546_s20 = scalar_lea.vmem %s2896_s9, 4096  ;;  %p3198_p6 = pmov %p3197_p13 }
  0x80   : > { %p2547_p4 = scmp.ne.s32.totalorder %s2896_s9, %s2546_s20  ;;  %s2662_s14 = smov [#allocation9]  }
  0x81   : > { %s2551_s17 = sshll.u32 %s2662_s14, 4  ;;  %s2552_s17 = int_to_ptr.vmem [resolvable:$false] %s2551_s17 }
  0x82   : > { %p2549_p10 = pnand %p2547_p4, %p3198_p6  ;;  %s2553_s22 = scalar_lea.vmem %s2552_s17, 8192 }
  0x83   : > { %p2554_p13 = scmp.lt.s32.totalorder %s2896_s9, %s2552_s17  ;;  %p2555_p1 = scmp.lt.s32.totalorder %s2553_s22, %s2546_s20 }
  0x84   : > { %p2550_p7 = pneg %p2549_p10 }
  0x85   : > { %p2556_p12 = por %p2555_p1, %p2554_p13 }
  0x87   : > { %p2557_p0 = pnand %p2556_p12, %p2550_p7 }
  0x89   : > { %2560 = shalt.err (!%p2557_p0)
}
  0x8a   : > { %s2663_s10 = smov 128   ;;  %s2664_s12 = smov 8  }
  0x8b   : > { %2298 = dma.hbm_to_vmem [thread:$0]  (!%p3196_p3), %s2871_s18, 4096, %s2896_s9, %s2835_s29, %s2663_s10, %s2663_s10, %s2664_s12  }
  0x8c   : > { %p3199_p8 = scmp.ne.s32.totalorder %s3182_s8, 0 }
  0x8d   : > { %s301_s1 = sand.u32 (!%p3199_p8), 1, %s2737_s5   ;;  %s2926_s21 = sand.u32 (!%p3199_p8), 1, %s2639_s24  }
  0x8e   : > { %299 = sbr.rel (%p3199_p8) target bundleno = 1049 (0x419), region = 44  ;;  %s1778_s0 = sshll.u32 (!%p3199_p8), %s2926_s21, 7 }
  0x8f   : > { %s302_s6 = scalar_lea.sflag (!%p3199_p8), [#allocation5], %s301_s1  ;;  %s2931_s23 = scalar_lea.vmem (!%p3199_p8), [#allocation4], %s1778_s0 }
  0x90   : > { %p3200_p5 = scmp.ne.s32.totalorder (!%p3199_p8), %s3179_s30, 0 }
  0x95   : > { %2614 = dma.done.wait (%p3200_p5), %s302_s6, 2048  }
  0x96   : > { %2616 = vsyncadd (%p3200_p5), %s302_s6, 4294965248  ;;  %p3201_p3 = scmp.eq.s32.totalorder %s2737_s5, 0 }
  0x98   : > { %2618 = dma.done.wait (%p3201_p3), [#allocation8], 1024   ;;  %p3202_p9 = pmov %p3201_p3 }
  0x99   : > { %s1780_s8 = sshll.u32 %s2926_s21, 8 }
  0x9a   : > { %2620 = vsyncadd (%p3202_p9), [#allocation8], 4294966272  ;;  %s2942_s18 = scalar_lea.vmem [#allocation9], %s1780_s8 }
  0x9b   : > { %2622 = dma.done.wait (%p3200_p5), %s302_s6, 4096  }
  0x9c   : > { %2624 = vsyncadd (%p3200_p5), %s302_s6, 4294963200  ;;  %p3203_p11 = pmov %p3201_p3 }
  0x9d   : > { %p3204_p2 = pmov %p3201_p3 }
  0x9e   : > { %2626 = dma.done.wait (%p3203_p11), [#allocation8], 1024  }
  0x9f   : > { %2628 = vsyncadd (%p3204_p2), [#allocation8], 4294966272  ;;  %v2365_v0 = vld [vmem:[#allocation7] sm:$0xff]   ;;  %v2366_v1 = vld [vmem:[#allocation7 + $0x8] sm:$0xff]   ;;  %s748_s5 = sld [smem:[#allocation3]]  ;;  %s3073_s29 = scalar_lea.vmem [#allocation11], %s1778_s0 }
  0xa0   : > { %2175 = vmatprep.subr.bf16.mxu0 %v2365_v0  ;;  %v2367_v2 = vld [vmem:[#allocation7 + $0x10] sm:$0xff]   ;;  %v2368_v3 = vld [vmem:[#allocation7 + $0x18] sm:$0xff]   ;;  %v2373_v4 = vld [vmem:[%s2931_s23] sm:$0xff]   ;;  %s1919_s9 = sshll.u32 %s2647_s26, 11  ;;  %s1639_s25 = sshll.u32 %s3073_s29, 4  ;;  %s3096_s25 = int_to_ptr.vmem [resolvable:$true] %s1639_s25 }
  0xa1   : > { %2176 = vmatpush3.bf16.msra.mxu0 %v2365_v0  ;;  %2191 = vmatprep.mubr.bf16.mxu0 %v2373_v4  ;;  %v2369_v5 = vld [vmem:[#allocation7 + $0x20] sm:$0xff]   ;;  %v2370_v6 = vld [vmem:[#allocation7 + $0x28] sm:$0xff]   ;;  %v2371_v7 = vld [vmem:[#allocation7 + $0x30] sm:$0xff]   ;;  %s3205_s11 = sld [smem:[#allocation25_spill]]  ;;  %s1624_s19 = scalar_lea.sflag [#allocation6], %s2926_s21 }
  0xa2   : > { %2177 = vmatprep.subr.bf16.mxu0 %v2366_v1  ;;  %v2372_v8 = vld [vmem:[#allocation7 + $0x38] sm:$0xff]   ;;  %v2374_v9 = vld [vmem:[%s2931_s23 + $0x8] sm:$0xff]   ;;  %v2375_v10 = vld [vmem:[%s2931_s23 + $0x10] sm:$0xff]   ;;  %s2561_s26 = scalar_lea.vmem %s3096_s25, 2048  ;;  %p3206_p6 = scmp.ne.s32.totalorder %s3188_s15, 0 }
  0xa3   : > { %v2376_v11 = vld [vmem:[%s2931_s23 + $0x18] sm:$0xff]   ;;  %v2377_v12 = vld [vmem:[%s2931_s23 + $0x20] sm:$0xff]   ;;  %v2378_v13 = vld [vmem:[%s2931_s23 + $0x28] sm:$0xff]   ;;  %p2562_p4 = scmp.ne.s32.totalorder %s3096_s25, %s2561_s26  ;;  %s2665_s20 = smov [#allocation11]  }
  0xa4   : > { %v2379_v14 = vld [vmem:[%s2931_s23 + $0x30] sm:$0xff]   ;;  %v2380_v15 = vld [vmem:[%s2931_s23 + $0x38] sm:$0xff]   ;;  %v2381_v16 = vld [vmem:[%s2931_s23 + $0x40] sm:$0xff]   ;;  %s2565_s14 = sshll.u32 %s2665_s20, 4  ;;  %s2566_s14 = int_to_ptr.vmem [resolvable:$false] %s2565_s14 }
  0xa5   : > { %2178 = vmatpush3.bf16.msra.mxu0 %v2366_v1  ;;  %v2382_v17 = vld [vmem:[%s2931_s23 + $0x48] sm:$0xff]   ;;  %v2383_v18 = vld [vmem:[%s2931_s23 + $0x50] sm:$0xff]   ;;  %v2384_v19 = vld [vmem:[%s2931_s23 + $0x58] sm:$0xff]   ;;  %p2563_p10 = pnand %p2562_p4, %p3206_p6  ;;  %s2567_s17 = scalar_lea.vmem %s2566_s14, 4096 }
  0xa6   : > { %2179 = vmatprep.subr.bf16.mxu0 %v2367_v2  ;;  %v2385_v20 = vld [vmem:[%s2931_s23 + $0x60] sm:$0xff]   ;;  %v2386_v21 = vld [vmem:[%s2931_s23 + $0x68] sm:$0xff]   ;;  %v2387_v22 = vld [vmem:[%s2931_s23 + $0x70] sm:$0xff]   ;;  %p2568_p13 = scmp.lt.s32.totalorder %s3096_s25, %s2566_s14  ;;  %p2569_p1 = scmp.lt.s32.totalorder %s2567_s17, %s2561_s26 }
  0xa7   : > { %v2388_v23 = vld [vmem:[%s2931_s23 + $0x78] sm:$0xff]   ;;  %v2391_v24 = vld [vmem:[%s2942_s18 + $0x4] ss:$8 sps:$4 sm:$0xff]   ;;  %s3094_s13 = scalar_lea.hbm %s3205_s11, %s1919_s9  ;;  %p2564_p7 = pneg %p2563_p10 }
  0xa8   : > { %996 = vmatprep.mubr.bf16.mxu1 %v2391_v24  ;;  %v2409_v24 = vld [vmem:[%s2942_s18 + $0x60] ss:$8 sps:$4 sm:$0xff]   ;;  %p2570_p12 = por %p2569_p1, %p2568_p13 }
  0xa9   : > { %2180 = vmatpush3.bf16.msra.mxu0 %v2367_v2 }
  0xaa   : > { %2181 = vmatprep.subr.bf16.mxu0 %v2368_v3  ;;  %p2571_p0 = pnand %p2570_p12, %p2564_p7 }
  0xad   : > { %2182 = vmatpush3.bf16.msra.mxu0 %v2368_v3 }
  0xae   : > { %2183 = vmatprep.subr.bf16.mxu0 %v2369_v5 }
  0xb1   : > { %2184 = vmatpush3.bf16.msra.mxu0 %v2369_v5 }
  0xb2   : > { %2185 = vmatprep.subr.bf16.mxu0 %v2370_v6 }
  0xb5   : > { %2186 = vmatpush3.bf16.msra.mxu0 %v2370_v6 }
  0xb6   : > { %2187 = vmatprep.subr.bf16.mxu0 %v2371_v7 }
  0xb9   : > { %2188 = vmatpush3.bf16.msra.mxu0 %v2371_v7 }
  0xba   : > { %2189 = vmatprep.subr.bf16.mxu0 %v2372_v8 }
  0xbd   : > { %2190 = vmatpush3.bf16.msra.mxu0 %v2372_v8 }
  0xc0   : > { %2192 = vmatmul.mubr.bf16.vlgmr.msra.gmra.mrb[0].mxu0 %v2374_v9  ;;  %v2437_v9 = vld [vmem:[#allocation10] sm:$0xff]  }
  0xc1   : > { %2195 = vmatprep.mubr.bf16.mxu0 %v2375_v10  ;;  %v2438_v10 = vld [vmem:[#allocation10 + $0x8] sm:$0xff]   ;;  %2223 = vmatprep.subr.bf16.mxu0 %v2437_v9 }
  0xc2   : > { %2224 = vmatpush3.bf16.msra.mxu0 %v2437_v9 }
  0xc3   : > { %2225 = vmatprep.subr.bf16.mxu0 %v2438_v10 }
  0xc6   : > { %2226 = vmatpush3.bf16.msra.mxu0 %v2438_v10 }
  0xc8   : > { %2196 = vmatmul.mubr.bf16.gmra.mrb[4].mxu0 %v2376_v11  ;;  %v2389_v11 = vld [vmem:[%s2942_s18] ss:$8 sps:$4 sm:$0xff]  }
  0xc9   : > { %2199 = vmatprep.mubr.bf16.mxu0 %v2377_v12  ;;  %v2439_v12 = vld [vmem:[#allocation10 + $0x10] sm:$0xff]  }
  0xca   : > { %2227 = vmatprep.subr.bf16.mxu0 %v2439_v12 }
  0xcb   : > { %2228 = vmatpush3.bf16.msra.mxu0 %v2439_v12 }
  0xd0   : > { %2200 = vmatmul.mubr.bf16.gmra.mrb[8].mxu0 %v2378_v13  ;;  %v2392_v13 = vld [vmem:[%s2942_s18 + $0x14] ss:$8 sps:$4 sm:$0xff]  }
  0xd1   : > { %2203 = vmatprep.mubr.bf16.mxu0 %v2379_v14  ;;  %v2394_v14 = vld [vmem:[%s2942_s18 + $0x10] ss:$8 sps:$4 sm:$0xff]  }
  0xd8   : > { %2204 = vmatmul.mubr.bf16.gmra.mrb[12].mxu0 %v2380_v15  ;;  %v2395_v15 = vld [vmem:[%s2942_s18 + $0x24] ss:$8 sps:$4 sm:$0xff]  }
  0xd9   : > { %2207 = vmatprep.mubr.bf16.mxu0 %v2381_v16  ;;  %v2397_v16 = vld [vmem:[%s2942_s18 + $0x20] ss:$8 sps:$4 sm:$0xff]  }
  0xe0   : > { %2208 = vmatmul.mubr.bf16.gmra.mrb[16].mxu0 %v2382_v17  ;;  %v2398_v17 = vld [vmem:[%s2942_s18 + $0x34] ss:$8 sps:$4 sm:$0xff]  }
  0xe1   : > { %2211 = vmatprep.mubr.bf16.mxu0 %v2383_v18  ;;  %v2400_v18 = vld [vmem:[%s2942_s18 + $0x30] ss:$8 sps:$4 sm:$0xff]  }
  0xe8   : > { %2212 = vmatmul.mubr.bf16.gmra.mrb[20].mxu0 %v2384_v19  ;;  %v2401_v19 = vld [vmem:[%s2942_s18 + $0x44] ss:$8 sps:$4 sm:$0xff]  }
  0xe9   : > { %2215 = vmatprep.mubr.bf16.mxu0 %v2385_v20  ;;  %v2403_v20 = vld [vmem:[%s2942_s18 + $0x40] ss:$8 sps:$4 sm:$0xff]  }
  0xf0   : > { %2216 = vmatmul.mubr.bf16.gmra.mrb[24].mxu0 %v2386_v21  ;;  %v2404_v21 = vld [vmem:[%s2942_s18 + $0x54] ss:$8 sps:$4 sm:$0xff]  }
  0xf1   : > { %2219 = vmatprep.mubr.bf16.mxu0 %v2387_v22  ;;  %v2406_v22 = vld [vmem:[%s2942_s18 + $0x50] ss:$8 sps:$4 sm:$0xff]  }
  0xf8   : > { %2220 = vmatmul.mubr.bf16.gmra.mrb[28].mxu0 %v2388_v23  ;;  %v2407_v23 = vld [vmem:[%s2942_s18 + $0x64] ss:$8 sps:$4 sm:$0xff]  }
 0x193   : > { %v2193_v25 = vpop.f32.mrb[0].mxu0 }
 0x194   : > { %v589_v26 = vpop.f32.mrb[1].mxu0 }
 0x195   : > { %v2194_v27 = vpop.f32.mrb[2].mxu0 }
 0x196   : > { %v717_v28 = vpack.c.bf16 %v2194_v27, %v2193_v25  ;;  %v592_v29 = vpop.f32.mrb[3].mxu0  ;;  %v2410_v25 = vld [vmem:[%s2942_s18 + $0x74] ss:$8 sps:$4 sm:$0xff]   ;;  %v2413_v27 = vld [vmem:[%s2942_s18 + $0x84] ss:$8 sps:$4 sm:$0xff]  }
 0x197   : > { %v716_v30 = vpack.c.bf16 %v592_v29, %v589_v26  ;;  %v2412_v26 = vld [vmem:[%s2942_s18 + $0x70] ss:$8 sps:$4 sm:$0xff]   ;;  %v2416_v29 = vld [vmem:[%s2942_s18 + $0x94] ss:$8 sps:$4 sm:$0xff]  }
 0x19b   : > { %v2197_v31 = vpop.f32.mrb[4].mxu0 }
 0x19c   : > { %v605_v32 = vpop.f32.mrb[5].mxu0 }
 0x19d   : > { %v2198_v33 = vpop.f32.mrb[6].mxu0 }
 0x19e   : > { %v719_v34 = vpack.c.bf16 %v2198_v33, %v2197_v31  ;;  %v608_v35 = vpop.f32.mrb[7].mxu0  ;;  %v2419_v31 = vld [vmem:[%s2942_s18 + $0xa4] ss:$8 sps:$4 sm:$0xff]   ;;  %v2422_v33 = vld [vmem:[%s2942_s18 + $0xb4] ss:$8 sps:$4 sm:$0xff]  }
 0x19f   : > { %v718_v36 = vpack.c.bf16 %v608_v35, %v605_v32  ;;  %v2421_v32 = vld [vmem:[%s2942_s18 + $0xa0] ss:$8 sps:$4 sm:$0xff]   ;;  %v2424_v35 = vld [vmem:[%s2942_s18 + $0xb0] ss:$8 sps:$4 sm:$0xff]  }
 0x1a3   : > { %v2201_v37 = vpop.f32.mrb[8].mxu0 }
 0x1a4   : > { %v621_v38 = vpop.f32.mrb[9].mxu0 }
 0x1a5   : > { %v2202_v39 = vpop.f32.mrb[10].mxu0 }
 0x1a6   : > { %v721_v40 = vpack.c.bf16 %v2202_v39, %v2201_v37  ;;  %v624_v41 = vpop.f32.mrb[11].mxu0  ;;  %v2441_v37 = vld [vmem:[#allocation10 + $0x20] sm:$0xff]  }
 0x1a7   : > { %v720_v42 = vpack.c.bf16 %v624_v41, %v621_v38  ;;  %v2442_v38 = vld [vmem:[#allocation10 + $0x28] sm:$0xff]   ;;  %v2443_v41 = vld [vmem:[#allocation10 + $0x30] sm:$0xff]  }
 0x1a8   : > { %v2427_v39 = vld [vmem:[%s2942_s18 + $0xc0] ss:$8 sps:$4 sm:$0xff]  }
 0x1ab   : > { %v2205_v43 = vpop.f32.mrb[12].mxu0 }
 0x1ac   : > { %v637_v44 = vpop.f32.mrb[13].mxu0 }
 0x1ad   : > { %v2206_v45 = vpop.f32.mrb[14].mxu0 }
 0x1ae   : > { %v723_v46 = vpack.c.bf16 %v2206_v45, %v2205_v43  ;;  %v640_v47 = vpop.f32.mrb[15].mxu0  ;;  %v2430_v43 = vld [vmem:[%s2942_s18 + $0xd0] ss:$8 sps:$4 sm:$0xff]   ;;  %v2433_v45 = vld [vmem:[%s2942_s18 + $0xe0] ss:$8 sps:$4 sm:$0xff]  }
 0x1af   : > { %v722_v48 = vpack.c.bf16 %v640_v47, %v637_v44  ;;  %v2431_v44 = vld [vmem:[%s2942_s18 + $0xe4] ss:$8 sps:$4 sm:$0xff]   ;;  %v2436_v47 = vld [vmem:[%s2942_s18 + $0xf0] ss:$8 sps:$4 sm:$0xff]  }
 0x1b3   : > { %v2209_v49 = vpop.f32.mrb[16].mxu0 }
 0x1b4   : > { %v653_v50 = vpop.f32.mrb[17].mxu0 }
 0x1b5   : > { %v2210_v51 = vpop.f32.mrb[18].mxu0 }
 0x1b6   : > { %v725_v52 = vpack.c.bf16 %v2210_v51, %v2209_v49  ;;  %v656_v53 = vpop.f32.mrb[19].mxu0  ;;  %v3003_v49 = vld [vmem:[%s3150_s3] ss:$0 sm:$0xff] }
 0x1b7   : > { %v724_v54 = vpack.c.bf16 %v656_v53, %v653_v50  ;;  %v3005_v53 = vstv %s748_s5 }
 0x1b9   : > { %2039 = vmatprep.subr.bf16.mxu1 %v724_v54 }
 0x1ba   : > { %2040 = vmatpush3.bf16.msra.mxu1 %v716_v30  ;;  %v2418_v30 = vld [vmem:[%s2942_s18 + $0x90] ss:$8 sps:$4 sm:$0xff]  }
 0x1bb   : > { %v2213_v55 = vpop.f32.mrb[20].mxu0  ;;  %2041 = vmatprep.subr.bf16.mxu1 %v725_v52 }
 0x1bc   : > { %v669_v56 = vpop.f32.mrb[21].mxu0 }
 0x1bd   : > { %v2214_v57 = vpop.f32.mrb[22].mxu0 }
 0x1be   : > { %v727_v58 = vpack.c.bf16 %v2214_v57, %v2213_v55  ;;  %v672_v59 = vpop.f32.mrb[23].mxu0  ;;  %2042 = vmatpush3.bf16.msra.mxu1 %v717_v28  ;;  %v2415_v28 = vld [vmem:[%s2942_s18 + $0x80] ss:$8 sps:$4 sm:$0xff]  }
 0x1bf   : > { %v726_v60 = vpack.c.bf16 %v672_v59, %v669_v56 }
 0x1c1   : > { %2043 = vmatprep.subr.bf16.mxu1 %v726_v60 }
 0x1c2   : > { %2044 = vmatpush3.bf16.msra.mxu1 %v718_v36  ;;  %v2425_v36 = vld [vmem:[%s2942_s18 + $0xc4] ss:$8 sps:$4 sm:$0xff]  }
 0x1c3   : > { %v2217_v61 = vpop.f32.mrb[24].mxu0  ;;  %2045 = vmatprep.subr.bf16.mxu1 %v727_v58 }
 0x1c4   : > { %v685_v62 = vpop.f32.mrb[25].mxu0 }
 0x1c5   : > { %v2218_v63 = vpop.f32.mrb[26].mxu0 }
 0x1c6   : > { %v729_v0 = vpack.c.bf16 %v2218_v63, %v2217_v61  ;;  %v688_v1 = vpop.f32.mrb[27].mxu0  ;;  %2046 = vmatpush3.bf16.msra.mxu1 %v719_v34  ;;  %v2440_v34 = vld [vmem:[#allocation10 + $0x18] sm:$0xff]  }
 0x1c7   : > { %v728_v2 = vpack.c.bf16 %v688_v1, %v685_v62  ;;  %2229 = vmatprep.subr.bf16.mxu0 %v2440_v34 }
 0x1c8   : > { %2230 = vmatpush3.bf16.msra.mxu0 %v2440_v34 }
 0x1c9   : > { %2047 = vmatprep.subr.bf16.mxu1 %v728_v2  ;;  %2231 = vmatprep.subr.bf16.mxu0 %v2441_v37 }
 0x1ca   : > { %2048 = vmatpush3.bf16.msra.mxu1 %v720_v42  ;;  %v2444_v42 = vld [vmem:[#allocation10 + $0x38] sm:$0xff]  }
 0x1cb   : > { %v2221_v3 = vpop.f32.mrb[28].mxu0  ;;  %2049 = vmatprep.subr.bf16.mxu1 %v729_v0 }
 0x1cc   : > { %v701_v4 = vpop.f32.mrb[29].mxu0  ;;  %2232 = vmatpush3.bf16.msra.mxu0 %v2441_v37 }
 0x1cd   : > { %v2222_v5 = vpop.f32.mrb[30].mxu0  ;;  %2233 = vmatprep.subr.bf16.mxu0 %v2442_v38 }
 0x1ce   : > { %v731_v6 = vpack.c.bf16 %v2222_v5, %v2221_v3  ;;  %v704_v7 = vpop.f32.mrb[31].mxu0  ;;  %2050 = vmatpush3.bf16.msra.mxu1 %v721_v40  ;;  %v2428_v40 = vld [vmem:[%s2942_s18 + $0xd4] ss:$8 sps:$4 sm:$0xff]  }
 0x1cf   : > { %v730_v8 = vpack.c.bf16 %v704_v7, %v701_v4 }
 0x1d0   : > { %2234 = vmatpush3.bf16.msra.mxu0 %v2442_v38 }
 0x1d1   : > { %2051 = vmatprep.subr.bf16.mxu1 %v730_v8  ;;  %2235 = vmatprep.subr.bf16.mxu0 %v2443_v41 }
 0x1d2   : > { %2052 = vmatpush3.bf16.msra.mxu1 %v722_v48 }
 0x1d3   : > { %2053 = vmatprep.subr.bf16.mxu1 %v731_v6 }
 0x1d4   : > { %2236 = vmatpush3.bf16.msra.mxu0 %v2443_v41 }
 0x1d5   : > { %2237 = vmatprep.subr.bf16.mxu0 %v2444_v42 }
 0x1d6   : > { %2054 = vmatpush3.bf16.msra.mxu1 %v723_v46  ;;  %v2434_v46 = vld [vmem:[%s2942_s18 + $0xf4] ss:$8 sps:$4 sm:$0xff]  }
 0x1d8   : > { %2238 = vmatpush3.bf16.msra.mxu0 %v2444_v42 }
 0x1d9   : > { %997 = vmatmul.mubr.bf16.vlgmr.msra.gmra.mrb[0].mxu1 %v2389_v11 }
 0x1da   : > { %1004 = vmatprep.mubr.bf16.mxu1 %v2392_v13 }
 0x1e1   : > { %1005 = vmatmul.mubr.bf16.gmra.mrb[4].mxu1 %v2394_v14 }
 0x1e2   : > { %1012 = vmatprep.mubr.bf16.mxu1 %v2395_v15 }
 0x1e9   : > { %1013 = vmatmul.mubr.bf16.gmra.mrb[8].mxu1 %v2397_v16 }
 0x1ea   : > { %1020 = vmatprep.mubr.bf16.mxu1 %v2398_v17 }
 0x1f1   : > { %1021 = vmatmul.mubr.bf16.gmra.mrb[12].mxu1 %v2400_v18 }
 0x1f2   : > { %1028 = vmatprep.mubr.bf16.mxu1 %v2401_v19 }
 0x1f9   : > { %1029 = vmatmul.mubr.bf16.gmra.mrb[16].mxu1 %v2403_v20 }
 0x1fa   : > { %1036 = vmatprep.mubr.bf16.mxu1 %v2404_v21 }
 0x201   : > { %1037 = vmatmul.mubr.bf16.gmra.mrb[20].mxu1 %v2406_v22 }
 0x202   : > { %1044 = vmatprep.mubr.bf16.mxu1 %v2407_v23 }
 0x209   : > { %1045 = vmatmul.mubr.bf16.gmra.mrb[24].mxu1 %v2409_v24 }
 0x20a   : > { %1052 = vmatprep.mubr.bf16.mxu1 %v2410_v25 }
 0x211   : > { %1053 = vmatmul.mubr.bf16.gmra.mrb[28].mxu1 %v2412_v26 }
 0x212   : > { %1060 = vmatprep.mubr.bf16.mxu1 %v2413_v27 }
 0x219   : > { %1061 = vmatmul.mubr.bf16.gmra.mrb[32].mxu1 %v2415_v28 }
 0x21a   : > { %1068 = vmatprep.mubr.bf16.mxu1 %v2416_v29 }
 0x221   : > { %1069 = vmatmul.mubr.bf16.gmra.mrb[36].mxu1 %v2418_v30 }
 0x222   : > { %1076 = vmatprep.mubr.bf16.mxu1 %v2419_v31 }
 0x229   : > { %1077 = vmatmul.mubr.bf16.gmra.mrb[40].mxu1 %v2421_v32 }
 0x22a   : > { %1084 = vmatprep.mubr.bf16.mxu1 %v2422_v33 }
 0x231   : > { %1085 = vmatmul.mubr.bf16.gmra.mrb[44].mxu1 %v2424_v35 }
 0x232   : > { %1092 = vmatprep.mubr.bf16.mxu1 %v2425_v36 }
 0x239   : > { %1093 = vmatmul.mubr.bf16.gmra.mrb[48].mxu1 %v2427_v39 }
 0x23a   : > { %1100 = vmatprep.mubr.bf16.mxu1 %v2428_v40 }
 0x241   : > { %1101 = vmatmul.mubr.bf16.gmra.mrb[52].mxu1 %v2430_v43 }
 0x242   : > { %1108 = vmatprep.mubr.bf16.mxu1 %v2431_v44 }
 0x249   : > { %1109 = vmatmul.mubr.bf16.gmra.mrb[56].mxu1 %v2433_v45 }
 0x24a   : > { %1116 = vmatprep.mubr.bf16.mxu1 %v2434_v46 }
 0x251   : > { %1117 = vmatmul.mubr.bf16.gmra.mrb[60].mxu1 %v2436_v47 }
 0x2ac   : > { %v2055_v48 = vpop.f32.mrb[0].mxu1 }
 0x2ad   : > { %v2056_v50 = vpop.f32.mrb[1].mxu1 }
 0x2ae   : > { %v2057_v51 = vadd.f32 %v2056_v50, %v2055_v48  ;;  %v2058_v52 = vpop.f32.mrb[2].mxu1 }
 0x2af   : > { %v2059_v54 = vpop.f32.mrb[3].mxu1 }
 0x2b0   : > { %v999_v55 = vadd.f32 %v2057_v51, %v3003_v49  ;;  %v2060_v56 = vadd.f32 %v2059_v54, %v2058_v52 }
 0x2b2   : > { %v1158_v57 = vmul.f32 %v3005_v53, %v999_v55  ;;  %v1002_v58 = vadd.f32 %v2060_v56, %v3003_v49  ;;  %vm1125_vm0 = vcmp.ge.f32.partialorder %v999_v55, 0.0 }
 0x2b4   : > { %vm1126_vm1 = vcmp.ge.f32.partialorder %v1002_v58, 0.0  ;;  %v1159_v59 = vmul.f32 %v3005_v53, %v1002_v58  ;;  %v2061_v60 = vpop.f32.mrb[4].mxu1  ;;  %v1190_v0 = vsel %vm1125_vm0, %v999_v55, %v1158_v57 }
 0x2b5   : > { %v2062_v61 = vpop.f32.mrb[5].mxu1 }
 0x2b6   : > { %v2063_v62 = vadd.f32 %v2062_v61, %v2061_v60  ;;  %v2064_v63 = vpop.f32.mrb[6].mxu1  ;;  %v1191_v1 = vsel %vm1126_vm1, %v1002_v58, %v1159_v59 }
 0x2b7   : > { %v2065_v2 = vpop.f32.mrb[7].mxu1  ;;  %v1222_v3 = vpack.c.bf16 %v1191_v1, %v1190_v0 }
 0x2b8   : > { %v1007_v4 = vadd.f32 %v2063_v62, %v3003_v49  ;;  %v2066_v5 = vadd.f32 %v2065_v2, %v2064_v63 }
 0x2b9   : > { %2239 = vmatprep.mubr.bf16.mxu0 %v1222_v3 }
 0x2ba   : > { %v1160_v6 = vmul.f32 %v3005_v53, %v1007_v4  ;;  %v1010_v7 = vadd.f32 %v2066_v5, %v3003_v49  ;;  %vm1127_vm2 = vcmp.ge.f32.partialorder %v1007_v4, 0.0 }
 0x2bc   : > { %vm1128_vm3 = vcmp.ge.f32.partialorder %v1010_v7, 0.0  ;;  %v1161_v8 = vmul.f32 %v3005_v53, %v1010_v7  ;;  %v2067_v9 = vpop.f32.mrb[8].mxu1  ;;  %v1192_v11 = vsel %vm1127_vm2, %v1007_v4, %v1160_v6 }
 0x2bd   : > { %v2068_v10 = vpop.f32.mrb[9].mxu1 }
 0x2be   : > { %v1193_v12 = vsel %vm1128_vm3, %v1010_v7, %v1161_v8  ;;  %v2069_v13 = vadd.f32 %v2068_v10, %v2067_v9  ;;  %v2070_v14 = vpop.f32.mrb[10].mxu1 }
 0x2bf   : > { %v1223_v15 = vpack.c.bf16 %v1193_v12, %v1192_v11  ;;  %v2071_v16 = vpop.f32.mrb[11].mxu1 }
 0x2c0   : > { %v1015_v17 = vadd.f32 %v2069_v13, %v3003_v49  ;;  %v2072_v18 = vadd.f32 %v2071_v16, %v2070_v14 }
 0x2c1   : > { %2240 = vmatmul.mubr.bf16.vlgmr.msra.gmra.mrb[32].mxu0 %v1223_v15 }
 0x2c2   : > { %v1162_v19 = vmul.f32 %v3005_v53, %v1015_v17  ;;  %v1018_v20 = vadd.f32 %v2072_v18, %v3003_v49  ;;  %vm1129_vm4 = vcmp.ge.f32.partialorder %v1015_v17, 0.0 }
 0x2c4   : > { %vm1130_vm5 = vcmp.ge.f32.partialorder %v1018_v20, 0.0  ;;  %v1163_v21 = vmul.f32 %v3005_v53, %v1018_v20  ;;  %v2073_v22 = vpop.f32.mrb[12].mxu1  ;;  %v1194_v26 = vsel %vm1129_vm4, %v1015_v17, %v1162_v19 }
 0x2c5   : > { %v2074_v23 = vpop.f32.mrb[13].mxu1 }
 0x2c6   : > { %v2075_v24 = vadd.f32 %v2074_v23, %v2073_v22  ;;  %v2076_v25 = vpop.f32.mrb[14].mxu1  ;;  %v1195_v27 = vsel %vm1130_vm5, %v1018_v20, %v1163_v21 }
 0x2c7   : > { %v2077_v28 = vpop.f32.mrb[15].mxu1  ;;  %v1224_v29 = vpack.c.bf16 %v1195_v27, %v1194_v26 }
 0x2c8   : > { %v1023_v30 = vadd.f32 %v2075_v24, %v3003_v49  ;;  %v2078_v31 = vadd.f32 %v2077_v28, %v2076_v25 }
 0x2c9   : > { %2243 = vmatprep.mubr.bf16.mxu0 %v1224_v29 }
 0x2ca   : > { %v1164_v32 = vmul.f32 %v3005_v53, %v1023_v30  ;;  %v1026_v33 = vadd.f32 %v2078_v31, %v3003_v49  ;;  %vm1131_vm6 = vcmp.ge.f32.partialorder %v1023_v30, 0.0 }
 0x2cc   : > { %vm1132_vm7 = vcmp.ge.f32.partialorder %v1026_v33, 0.0  ;;  %v1165_v34 = vmul.f32 %v3005_v53, %v1026_v33  ;;  %v2079_v35 = vpop.f32.mrb[16].mxu1  ;;  %v1196_v39 = vsel %vm1131_vm6, %v1023_v30, %v1164_v32 }
 0x2cd   : > { %v2080_v36 = vpop.f32.mrb[17].mxu1 }
 0x2ce   : > { %v2081_v37 = vadd.f32 %v2080_v36, %v2079_v35  ;;  %v2082_v38 = vpop.f32.mrb[18].mxu1  ;;  %v1197_v40 = vsel %vm1132_vm7, %v1026_v33, %v1165_v34 }
 0x2cf   : > { %v2083_v41 = vpop.f32.mrb[19].mxu1  ;;  %v1225_v42 = vpack.c.bf16 %v1197_v40, %v1196_v39 }
 0x2d0   : > { %v1031_v43 = vadd.f32 %v2081_v37, %v3003_v49  ;;  %v2084_v44 = vadd.f32 %v2083_v41, %v2082_v38 }
 0x2d1   : > { %2244 = vmatmul.mubr.bf16.gmra.mrb[36].mxu0 %v1225_v42 }
 0x2d2   : > { %v1166_v45 = vmul.f32 %v3005_v53, %v1031_v43  ;;  %v1034_v46 = vadd.f32 %v2084_v44, %v3003_v49  ;;  %vm1133_vm8 = vcmp.ge.f32.partialorder %v1031_v43, 0.0 }
 0x2d4   : > { %vm1134_vm9 = vcmp.ge.f32.partialorder %v1034_v46, 0.0  ;;  %v1167_v47 = vmul.f32 %v3005_v53, %v1034_v46  ;;  %v2085_v48 = vpop.f32.mrb[20].mxu1  ;;  %v1198_v54 = vsel %vm1133_vm8, %v1031_v43, %v1166_v45 }
 0x2d5   : > { %v2086_v50 = vpop.f32.mrb[21].mxu1 }
 0x2d6   : > { %v2087_v51 = vadd.f32 %v2086_v50, %v2085_v48  ;;  %v2088_v52 = vpop.f32.mrb[22].mxu1  ;;  %v1199_v55 = vsel %vm1134_vm9, %v1034_v46, %v1167_v47 }
 0x2d7   : > { %v2089_v56 = vpop.f32.mrb[23].mxu1  ;;  %v1226_v57 = vpack.c.bf16 %v1199_v55, %v1198_v54 }
 0x2d8   : > { %v1039_v58 = vadd.f32 %v2087_v51, %v3003_v49  ;;  %v2090_v59 = vadd.f32 %v2089_v56, %v2088_v52 }
 0x2d9   : > { %2247 = vmatprep.mubr.bf16.mxu0 %v1226_v57 }
 0x2da   : > { %v1168_v60 = vmul.f32 %v3005_v53, %v1039_v58  ;;  %v1042_v61 = vadd.f32 %v2090_v59, %v3003_v49  ;;  %vm1135_vm10 = vcmp.ge.f32.partialorder %v1039_v58, 0.0 }
 0x2dc   : > { %vm1136_vm11 = vcmp.ge.f32.partialorder %v1042_v61, 0.0  ;;  %v1169_v62 = vmul.f32 %v3005_v53, %v1042_v61  ;;  %v2091_v63 = vpop.f32.mrb[24].mxu1  ;;  %v1200_v3 = vsel %vm1135_vm10, %v1039_v58, %v1168_v60 }
 0x2dd   : > { %v2092_v0 = vpop.f32.mrb[25].mxu1 }
 0x2de   : > { %v2093_v1 = vadd.f32 %v2092_v0, %v2091_v63  ;;  %v2094_v2 = vpop.f32.mrb[26].mxu1  ;;  %v1201_v4 = vsel %vm1136_vm11, %v1042_v61, %v1169_v62 }
 0x2df   : > { %v2095_v5 = vpop.f32.mrb[27].mxu1  ;;  %v1227_v6 = vpack.c.bf16 %v1201_v4, %v1200_v3 }
 0x2e0   : > { %v1047_v7 = vadd.f32 %v2093_v1, %v3003_v49  ;;  %v2096_v8 = vadd.f32 %v2095_v5, %v2094_v2 }
 0x2e1   : > { %2248 = vmatmul.mubr.bf16.gmra.mrb[40].mxu0 %v1227_v6 }
 0x2e2   : > { %v1170_v9 = vmul.f32 %v3005_v53, %v1047_v7  ;;  %v1050_v10 = vadd.f32 %v2096_v8, %v3003_v49  ;;  %vm1137_vm12 = vcmp.ge.f32.partialorder %v1047_v7, 0.0 }
 0x2e4   : > { %vm1138_vm13 = vcmp.ge.f32.partialorder %v1050_v10, 0.0  ;;  %v1171_v11 = vmul.f32 %v3005_v53, %v1050_v10  ;;  %v2097_v12 = vpop.f32.mrb[28].mxu1  ;;  %v1202_v16 = vsel %vm1137_vm12, %v1047_v7, %v1170_v9 }
 0x2e5   : > { %v2098_v13 = vpop.f32.mrb[29].mxu1 }
 0x2e6   : > { %v2099_v14 = vadd.f32 %v2098_v13, %v2097_v12  ;;  %v2100_v15 = vpop.f32.mrb[30].mxu1  ;;  %v1203_v17 = vsel %vm1138_vm13, %v1050_v10, %v1171_v11 }
 0x2e7   : > { %v2101_v18 = vpop.f32.mrb[31].mxu1  ;;  %v1228_v19 = vpack.c.bf16 %v1203_v17, %v1202_v16 }
 0x2e8   : > { %v1055_v20 = vadd.f32 %v2099_v14, %v3003_v49  ;;  %v2102_v21 = vadd.f32 %v2101_v18, %v2100_v15 }
 0x2e9   : > { %2251 = vmatprep.mubr.bf16.mxu0 %v1228_v19 }
 0x2ea   : > { %v1172_v22 = vmul.f32 %v3005_v53, %v1055_v20  ;;  %v1058_v23 = vadd.f32 %v2102_v21, %v3003_v49  ;;  %vm1139_vm14 = vcmp.ge.f32.partialorder %v1055_v20, 0.0 }
 0x2ec   : > { %vm1140_vm15 = vcmp.ge.f32.partialorder %v1058_v23, 0.0  ;;  %v1173_v24 = vmul.f32 %v3005_v53, %v1058_v23  ;;  %v2103_v25 = vpop.f32.mrb[32].mxu1  ;;  %v1204_v29 = vsel %vm1139_vm14, %v1055_v20, %v1172_v22 }
 0x2ed   : > { %v2104_v26 = vpop.f32.mrb[33].mxu1 }
 0x2ee   : > { %v2105_v27 = vadd.f32 %v2104_v26, %v2103_v25  ;;  %v2106_v28 = vpop.f32.mrb[34].mxu1  ;;  %v1205_v30 = vsel %vm1140_vm15, %v1058_v23, %v1173_v24 }
 0x2ef   : > { %v2107_v31 = vpop.f32.mrb[35].mxu1  ;;  %v1229_v32 = vpack.c.bf16 %v1205_v30, %v1204_v29 }
 0x2f0   : > { %v1063_v33 = vadd.f32 %v2105_v27, %v3003_v49  ;;  %v2108_v34 = vadd.f32 %v2107_v31, %v2106_v28 }
 0x2f1   : > { %2252 = vmatmul.mubr.bf16.gmra.mrb[44].mxu0 %v1229_v32 }
 0x2f2   : > { %v1174_v35 = vmul.f32 %v3005_v53, %v1063_v33  ;;  %v1066_v36 = vadd.f32 %v2108_v34, %v3003_v49  ;;  %vm1141_vm0 = vcmp.ge.f32.partialorder %v1063_v33, 0.0 }
 0x2f4   : > { %vm1142_vm1 = vcmp.ge.f32.partialorder %v1066_v36, 0.0  ;;  %v1175_v37 = vmul.f32 %v3005_v53, %v1066_v36  ;;  %v2109_v38 = vpop.f32.mrb[36].mxu1  ;;  %v1206_v42 = vsel %vm1141_vm0, %v1063_v33, %v1174_v35 }
 0x2f5   : > { %v2110_v39 = vpop.f32.mrb[37].mxu1 }
 0x2f6   : > { %v2111_v40 = vadd.f32 %v2110_v39, %v2109_v38  ;;  %v2112_v41 = vpop.f32.mrb[38].mxu1  ;;  %v1207_v43 = vsel %vm1142_vm1, %v1066_v36, %v1175_v37 }
 0x2f7   : > { %v2113_v44 = vpop.f32.mrb[39].mxu1  ;;  %v1230_v45 = vpack.c.bf16 %v1207_v43, %v1206_v42 }
 0x2f8   : > { %v1071_v46 = vadd.f32 %v2111_v40, %v3003_v49  ;;  %v2114_v47 = vadd.f32 %v2113_v44, %v2112_v41 }
 0x2f9   : > { %2255 = vmatprep.mubr.bf16.mxu0 %v1230_v45 }
 0x2fa   : > { %v1176_v48 = vmul.f32 %v3005_v53, %v1071_v46  ;;  %v1074_v50 = vadd.f32 %v2114_v47, %v3003_v49  ;;  %vm1143_vm2 = vcmp.ge.f32.partialorder %v1071_v46, 0.0 }
 0x2fc   : > { %vm1144_vm3 = vcmp.ge.f32.partialorder %v1074_v50, 0.0  ;;  %v1177_v51 = vmul.f32 %v3005_v53, %v1074_v50  ;;  %v2115_v52 = vpop.f32.mrb[40].mxu1  ;;  %v1208_v57 = vsel %vm1143_vm2, %v1071_v46, %v1176_v48 }
 0x2fd   : > { %v2116_v54 = vpop.f32.mrb[41].mxu1 }
 0x2fe   : > { %v2117_v55 = vadd.f32 %v2116_v54, %v2115_v52  ;;  %v2118_v56 = vpop.f32.mrb[42].mxu1  ;;  %v1209_v58 = vsel %vm1144_vm3, %v1074_v50, %v1177_v51 }
 0x2ff   : > { %v2119_v59 = vpop.f32.mrb[43].mxu1  ;;  %v1231_v60 = vpack.c.bf16 %v1209_v58, %v1208_v57 }
 0x300   : > { %v1079_v61 = vadd.f32 %v2117_v55, %v3003_v49  ;;  %v2120_v62 = vadd.f32 %v2119_v59, %v2118_v56 }
 0x301   : > { %2256 = vmatmul.mubr.bf16.gmra.mrb[48].mxu0 %v1231_v60 }
 0x302   : > { %v1178_v63 = vmul.f32 %v3005_v53, %v1079_v61  ;;  %v1082_v0 = vadd.f32 %v2120_v62, %v3003_v49  ;;  %vm1145_vm4 = vcmp.ge.f32.partialorder %v1079_v61, 0.0 }
 0x304   : > { %vm1146_vm5 = vcmp.ge.f32.partialorder %v1082_v0, 0.0  ;;  %v1179_v1 = vmul.f32 %v3005_v53, %v1082_v0  ;;  %v2121_v2 = vpop.f32.mrb[44].mxu1  ;;  %v1210_v6 = vsel %vm1145_vm4, %v1079_v61, %v1178_v63 }
 0x305   : > { %v2122_v3 = vpop.f32.mrb[45].mxu1 }
 0x306   : > { %v2123_v4 = vadd.f32 %v2122_v3, %v2121_v2  ;;  %v2124_v5 = vpop.f32.mrb[46].mxu1  ;;  %v1211_v7 = vsel %vm1146_vm5, %v1082_v0, %v1179_v1 }
 0x307   : > { %v2125_v8 = vpop.f32.mrb[47].mxu1  ;;  %v1232_v9 = vpack.c.bf16 %v1211_v7, %v1210_v6 }
 0x308   : > { %v1087_v10 = vadd.f32 %v2123_v4, %v3003_v49  ;;  %v2126_v11 = vadd.f32 %v2125_v8, %v2124_v5 }
 0x309   : > { %2259 = vmatprep.mubr.bf16.mxu0 %v1232_v9 }
 0x30a   : > { %v1180_v12 = vmul.f32 %v3005_v53, %v1087_v10  ;;  %v1090_v13 = vadd.f32 %v2126_v11, %v3003_v49  ;;  %vm1147_vm6 = vcmp.ge.f32.partialorder %v1087_v10, 0.0 }
 0x30c   : > { %vm1148_vm7 = vcmp.ge.f32.partialorder %v1090_v13, 0.0  ;;  %v1181_v14 = vmul.f32 %v3005_v53, %v1090_v13  ;;  %v2127_v15 = vpop.f32.mrb[48].mxu1  ;;  %v1212_v19 = vsel %vm1147_vm6, %v1087_v10, %v1180_v12 }
 0x30d   : > { %v2128_v16 = vpop.f32.mrb[49].mxu1 }
 0x30e   : > { %v2129_v17 = vadd.f32 %v2128_v16, %v2127_v15  ;;  %v2130_v18 = vpop.f32.mrb[50].mxu1  ;;  %v1213_v20 = vsel %vm1148_vm7, %v1090_v13, %v1181_v14 }
 0x30f   : > { %v2131_v21 = vpop.f32.mrb[51].mxu1  ;;  %v1233_v22 = vpack.c.bf16 %v1213_v20, %v1212_v19 }
 0x310   : > { %v1095_v23 = vadd.f32 %v2129_v17, %v3003_v49  ;;  %v2132_v24 = vadd.f32 %v2131_v21, %v2130_v18 }
 0x311   : > { %2260 = vmatmul.mubr.bf16.gmra.mrb[52].mxu0 %v1233_v22 }
 0x312   : > { %v1182_v25 = vmul.f32 %v3005_v53, %v1095_v23  ;;  %v1098_v26 = vadd.f32 %v2132_v24, %v3003_v49  ;;  %vm1149_vm8 = vcmp.ge.f32.partialorder %v1095_v23, 0.0 }
 0x314   : > { %vm1150_vm9 = vcmp.ge.f32.partialorder %v1098_v26, 0.0  ;;  %v1183_v27 = vmul.f32 %v3005_v53, %v1098_v26  ;;  %v2133_v28 = vpop.f32.mrb[52].mxu1  ;;  %v1214_v32 = vsel %vm1149_vm8, %v1095_v23, %v1182_v25 }
 0x315   : > { %v2134_v29 = vpop.f32.mrb[53].mxu1 }
 0x316   : > { %v2135_v30 = vadd.f32 %v2134_v29, %v2133_v28  ;;  %v2136_v31 = vpop.f32.mrb[54].mxu1  ;;  %v1215_v33 = vsel %vm1150_vm9, %v1098_v26, %v1183_v27 }
 0x317   : > { %v2137_v34 = vpop.f32.mrb[55].mxu1  ;;  %v1234_v35 = vpack.c.bf16 %v1215_v33, %v1214_v32 }
 0x318   : > { %v1103_v36 = vadd.f32 %v2135_v30, %v3003_v49  ;;  %v2138_v37 = vadd.f32 %v2137_v34, %v2136_v31 }
 0x319   : > { %2263 = vmatprep.mubr.bf16.mxu0 %v1234_v35 }
 0x31a   : > { %v1184_v38 = vmul.f32 %v3005_v53, %v1103_v36  ;;  %v1106_v39 = vadd.f32 %v2138_v37, %v3003_v49  ;;  %vm1151_vm10 = vcmp.ge.f32.partialorder %v1103_v36, 0.0 }
 0x31c   : > { %vm1152_vm11 = vcmp.ge.f32.partialorder %v1106_v39, 0.0  ;;  %v1185_v40 = vmul.f32 %v3005_v53, %v1106_v39  ;;  %v2139_v41 = vpop.f32.mrb[56].mxu1  ;;  %v1216_v45 = vsel %vm1151_vm10, %v1103_v36, %v1184_v38 }
 0x31d   : > { %v2140_v42 = vpop.f32.mrb[57].mxu1 }
 0x31e   : > { %v2141_v43 = vadd.f32 %v2140_v42, %v2139_v41  ;;  %v2142_v44 = vpop.f32.mrb[58].mxu1  ;;  %v1217_v46 = vsel %vm1152_vm11, %v1106_v39, %v1185_v40 }
 0x31f   : > { %v2143_v47 = vpop.f32.mrb[59].mxu1  ;;  %v1235_v48 = vpack.c.bf16 %v1217_v46, %v1216_v45 }
 0x320   : > { %v1111_v50 = vadd.f32 %v2141_v43, %v3003_v49  ;;  %v2144_v51 = vadd.f32 %v2143_v47, %v2142_v44 }
 0x321   : > { %2264 = vmatmul.mubr.bf16.gmra.mrb[56].mxu0 %v1235_v48 }
 0x322   : > { %v1186_v52 = vmul.f32 %v3005_v53, %v1111_v50  ;;  %v1114_v54 = vadd.f32 %v2144_v51, %v3003_v49  ;;  %vm1153_vm12 = vcmp.ge.f32.partialorder %v1111_v50, 0.0 }
 0x324   : > { %vm1154_vm13 = vcmp.ge.f32.partialorder %v1114_v54, 0.0  ;;  %v1187_v55 = vmul.f32 %v3005_v53, %v1114_v54  ;;  %v2145_v56 = vpop.f32.mrb[60].mxu1  ;;  %v1218_v60 = vsel %vm1153_vm12, %v1111_v50, %v1186_v52 }
 0x325   : > { %v2146_v57 = vpop.f32.mrb[61].mxu1 }
 0x326   : > { %v2147_v58 = vadd.f32 %v2146_v57, %v2145_v56  ;;  %v2148_v59 = vpop.f32.mrb[62].mxu1  ;;  %v1219_v61 = vsel %vm1154_vm13, %v1114_v54, %v1187_v55 }
 0x327   : > { %v2149_v62 = vpop.f32.mrb[63].mxu1  ;;  %v1236_v63 = vpack.c.bf16 %v1219_v61, %v1218_v60 }
 0x328   : > { %v1119_v0 = vadd.f32 %v2147_v58, %v3003_v49  ;;  %v2150_v1 = vadd.f32 %v2149_v62, %v2148_v59 }
 0x329   : > { %2267 = vmatprep.mubr.bf16.mxu0 %v1236_v63 }
 0x32a   : > { %v1188_v2 = vmul.f32 %v3005_v53, %v1119_v0  ;;  %v1122_v3 = vadd.f32 %v2150_v1, %v3003_v49  ;;  %vm1155_vm14 = vcmp.ge.f32.partialorder %v1119_v0, 0.0 }
 0x32c   : > { %vm1156_vm15 = vcmp.ge.f32.partialorder %v1122_v3, 0.0  ;;  %v1189_v4 = vmul.f32 %v3005_v53, %v1122_v3  ;;  %v1220_v5 = vsel %vm1155_vm14, %v1119_v0, %v1188_v2 }
 0x32e   : > { %v1221_v6 = vsel %vm1156_vm15, %v1122_v3, %v1189_v4 }
 0x32f   : > { %v1237_v7 = vpack.c.bf16 %v1221_v6, %v1220_v5 }
 0x331   : > { %2268 = vmatmul.mubr.bf16.gmra.mrb[60].mxu0 %v1237_v7 }
 0x394   : > { %v2241_v8 = vpop.f32.mrb[32].mxu0 }
 0x395   : > { %v1336_v9 = vpop.f32.mrb[33].mxu0 }
 0x396   : > { %v2242_v10 = vpop.f32.mrb[34].mxu0 }
 0x397   : > { %v1928_v11 = vpack.c.bf16 %v2242_v10, %v2241_v8  ;;  %v1339_v12 = vpop.f32.mrb[35].mxu0 }
 0x398   : > { %v1923_v13 = vpack.c.bf16 %v1339_v12, %v1336_v9 }
 0x399   : > { %2000 = vst [vmem:[%s3073_s29 + $0x8] sm:$0xff] %v1928_v11  }
 0x39a   : > { %1924 = vst [vmem:[%s3073_s29] sm:$0xff] %v1923_v13  }
 0x3a4   : > { %v2245_v49 = vpop.f32.mrb[36].mxu0 }
 0x3a5   : > { %v1352_v53 = vpop.f32.mrb[37].mxu0 }
 0x3a6   : > { %v2246_v14 = vpop.f32.mrb[38].mxu0 }
 0x3a7   : > { %v1938_v15 = vpack.c.bf16 %v2246_v14, %v2245_v49  ;;  %v1355_v16 = vpop.f32.mrb[39].mxu0 }
 0x3a8   : > { %v1933_v17 = vpack.c.bf16 %v1355_v16, %v1352_v53 }
 0x3a9   : > { %2002 = vst [vmem:[%s3073_s29 + $0x18] sm:$0xff] %v1938_v15  }
 0x3aa   : > { %2001 = vst [vmem:[%s3073_s29 + $0x10] sm:$0xff] %v1933_v17  }
 0x3b4   : > { %v2249_v18 = vpop.f32.mrb[40].mxu0 }
 0x3b5   : > { %v1368_v19 = vpop.f32.mrb[41].mxu0 }
 0x3b6   : > { %v2250_v20 = vpop.f32.mrb[42].mxu0 }
 0x3b7   : > { %v1948_v21 = vpack.c.bf16 %v2250_v20, %v2249_v18  ;;  %v1371_v22 = vpop.f32.mrb[43].mxu0 }
 0x3b8   : > { %v1943_v23 = vpack.c.bf16 %v1371_v22, %v1368_v19 }
 0x3b9   : > { %2004 = vst [vmem:[%s3073_s29 + $0x28] sm:$0xff] %v1948_v21  }
 0x3ba   : > { %2003 = vst [vmem:[%s3073_s29 + $0x20] sm:$0xff] %v1943_v23  }
 0x3c4   : > { %v2253_v24 = vpop.f32.mrb[44].mxu0 }
 0x3c5   : > { %v1384_v25 = vpop.f32.mrb[45].mxu0 }
 0x3c6   : > { %v2254_v26 = vpop.f32.mrb[46].mxu0 }
 0x3c7   : > { %v1958_v27 = vpack.c.bf16 %v2254_v26, %v2253_v24  ;;  %v1387_v28 = vpop.f32.mrb[47].mxu0 }
 0x3c8   : > { %v1953_v29 = vpack.c.bf16 %v1387_v28, %v1384_v25 }
 0x3c9   : > { %2006 = vst [vmem:[%s3073_s29 + $0x38] sm:$0xff] %v1958_v27  }
 0x3ca   : > { %2005 = vst [vmem:[%s3073_s29 + $0x30] sm:$0xff] %v1953_v29  }
 0x3d4   : > { %v2257_v30 = vpop.f32.mrb[48].mxu0 }
 0x3d5   : > { %v1400_v31 = vpop.f32.mrb[49].mxu0 }
 0x3d6   : > { %v2258_v32 = vpop.f32.mrb[50].mxu0 }
 0x3d7   : > { %v1968_v33 = vpack.c.bf16 %v2258_v32, %v2257_v30  ;;  %v1403_v34 = vpop.f32.mrb[51].mxu0 }
 0x3d8   : > { %v1963_v35 = vpack.c.bf16 %v1403_v34, %v1400_v31 }
 0x3d9   : > { %2008 = vst [vmem:[%s3073_s29 + $0x48] sm:$0xff] %v1968_v33  }
 0x3da   : > { %2007 = vst [vmem:[%s3073_s29 + $0x40] sm:$0xff] %v1963_v35  }
 0x3e4   : > { %v2261_v36 = vpop.f32.mrb[52].mxu0 }
 0x3e5   : > { %v1416_v37 = vpop.f32.mrb[53].mxu0 }
 0x3e6   : > { %v2262_v38 = vpop.f32.mrb[54].mxu0 }
 0x3e7   : > { %v1978_v39 = vpack.c.bf16 %v2262_v38, %v2261_v36  ;;  %v1419_v40 = vpop.f32.mrb[55].mxu0 }
 0x3e8   : > { %v1973_v41 = vpack.c.bf16 %v1419_v40, %v1416_v37 }
 0x3e9   : > { %2010 = vst [vmem:[%s3073_s29 + $0x58] sm:$0xff] %v1978_v39  }
 0x3ea   : > { %2009 = vst [vmem:[%s3073_s29 + $0x50] sm:$0xff] %v1973_v41  }
 0x3f4   : > { %v2265_v42 = vpop.f32.mrb[56].mxu0 }
 0x3f5   : > { %v1432_v43 = vpop.f32.mrb[57].mxu0 }
 0x3f6   : > { %v2266_v44 = vpop.f32.mrb[58].mxu0 }
 0x3f7   : > { %v1988_v45 = vpack.c.bf16 %v2266_v44, %v2265_v42  ;;  %v1435_v46 = vpop.f32.mrb[59].mxu0 }
 0x3f8   : > { %v1983_v47 = vpack.c.bf16 %v1435_v46, %v1432_v43 }
 0x3f9   : > { %2012 = vst [vmem:[%s3073_s29 + $0x68] sm:$0xff] %v1988_v45  }
 0x3fa   : > { %2011 = vst [vmem:[%s3073_s29 + $0x60] sm:$0xff] %v1983_v47  }
 0x404   : > { %v2269_v48 = vpop.f32.mrb[60].mxu0 }
 0x405   : > { %v1448_v50 = vpop.f32.mrb[61].mxu0 }
 0x406   : > { %v2270_v51 = vpop.f32.mrb[62].mxu0 }
 0x407   : > { %v1998_v52 = vpack.c.bf16 %v2270_v51, %v2269_v48  ;;  %v1451_v54 = vpop.f32.mrb[63].mxu0 }
 0x408   : > { %v1993_v55 = vpack.c.bf16 %v1451_v54, %v1448_v50 }
 0x409   : > { %2014 = vst [vmem:[%s3073_s29 + $0x78] sm:$0xff] %v1998_v52  }
 0x40a   : > { %2013 = vst [vmem:[%s3073_s29 + $0x70] sm:$0xff] %v1993_v55  }
 0x40b   : > { %2574 = shalt.err (!%p2571_p0)
}
 0x40c   : > { %s2575_s22 = scalar_lea.hbm %s3094_s13, 2048  ;;  %s2579_s1 = scalar_lea.hbm %s3205_s11, 4096 }
 0x40d   : > { %p2576_p8 = scmp.ne.s32.totalorder %s3094_s13, %s2575_s22  ;;  %p2580_p9 = scmp.lt.u32.totalorder %s3094_s13, %s3205_s11 }
 0x40e   : > { %p2581_p11 = scmp.lt.u32.totalorder %s2579_s1, %s2575_s22  ;;  %p2583_p4 = scmp.lt.u32.totalorder %s2575_s22, %s3094_s13 }
 0x40f   : > { %p2577_p5 = pnand %p2576_p8, %p3206_p6 }
 0x410   : > { %p2582_p2 = por %p2581_p11, %p2580_p9 }
 0x411   : > { %p2578_p3 = pneg %p2577_p5 }
 0x412   : > { %p2584_p10 = por %p2583_p4, %p2582_p2 }
 0x414   : > { %p2585_p7 = pnand %p2584_p10, %p2578_p3 }
 0x416   : > { %2588 = shalt.err (!%p2585_p7)
}
 0x417   : > { %s2666_s23 = smov 64   ;;  %s2667_s8 = smov 4  }
 0x418   : > { %2283 = dma.vmem_to_hbm [thread:$0]  (%p3206_p6), %s3096_s25, 2048, %s3094_s13, %s1624_s19, %s2666_s23, %s2666_s23, %s2667_s8  }
 0x419 PF: > { %s3207_s18 = sld [smem:[#allocation17_spill]]  ;;  %s3208_s5 = sld [smem:[#allocation20_spill]] }
 0x41a   : > { %s3209_s30 = sld [smem:[#allocation19_spill]] }
 0x41f   : > { %s1654_s16 = sand.u32 1, %s3207_s18   ;;  %p3210_p13 = scmp.ne.s32.totalorder %s3208_s5, 0 }
 0x420   : > { %p3211_p1 = scmp.ge.s32.totalorder %s3209_s30, 2  ;;  %s1655_s29 = scalar_lea.sflag [#allocation6], %s1654_s16 }
 0x422   : > { %p2300_p12 = pnand %p3211_p1, %p3210_p13 }
 0x424   : > { %2630 = dma.done.wait (!%p2300_p12), %s1655_s29, 2048  }
 0x425   : > { %2632 = vsyncadd (!%p2300_p12), %s1655_s29, 4294965248  ;;  %s24_s28 = sadd.s32 1, %s3209_s30   ;;  %s3212_s9 = sld [smem:[#allocation18_spill]] }
 0x426   : > { %p21_p0 = scmp.ge.s32.totalorder %s24_s28, 4   ;;  %s3213_s25 = sld [smem:[#allocation22_spill]] }
 0x427   : > { %s3214_s15 = sld [smem:[#allocation21_spill]]  ;;  %s3215_s23 = smov %s2639_s24 }
 0x428   : > { %s3217_s26 = smov %s2651_s27  ;;  %23 = sbr.rel (!%p21_p0) target bundleno = 12 (0xc), region = 112 }
 0x42b   : > { %s3216_s24 = smov %s3212_s9 }
 0x42d   : > { %s3218_s27 = smov %s3214_s15 }
 0x42f   :  { %1660 = vsyncpa [#allocation5], 1 }
 0x430   :  { %1662 = vsyncpa [#allocation5 + $0x1], 1 }
 0x431   :  { %1663 = vsyncpa [#allocation8], 1 }
 0x432   :  { %1664 = vsyncpa [#allocation6], 1 }
 0x433   :  { %1666 = vsyncpa [#allocation6 + $0x1], 1 }

</bundles_post_ra>
